<compile_context>
chip_gen: v6e
topology: v6e:2x2x1
jax: 0.10.0
libtpu: 0.0.40
codegen_flags: <defaults>
</compile_context>

<pallas_src>
import functools

import jax
import jax.numpy as jnp
import numpy as np
from jax import lax
from jax.experimental import pallas as pl
from jax.experimental.pallas import tpu as pltpu

# Tap enumeration order k = (oh+1)*3 + (ow+1); must match the fused-weight
# reshape in the wrapper and the mask row order (center tap has no mask).
_TAPS = tuple((oh, ow) for oh in (-1, 0, 1) for ow in (-1, 0, 1))


def _conv3x3_fused(inp, w_ref, b_ref, col_ref, mask_ref, W, L):
    """3x3 'same' conv on a (C_in, L) tile via a single im2col matmul.

    inp:      (C_in, L) f32, L = G*H*W (G images folded onto lanes)
    w_ref:    (C_out, 9*C_in) fused bf16 weights
    b_ref:    (C_out, 1) f32 bias
    col_ref:  (9*C_in, L) bf16 VMEM scratch for the im2col stack
    mask_ref: (8, L) f32 validity masks (zero padding at image borders; also
              prevents cross-image leakage of the lane-axis roll)
    """
    C_in = inp.shape[0]
    m = 0
    for k, (oh, ow) in enumerate(_TAPS):
        if oh == 0 and ow == 0:
            xs = inp
        else:
            s = oh * W + ow
            # shifted[:, p] = inp[:, (p + s) mod L]; invalid (padding /
            # cross-image) positions are zeroed by the mask row.
            xs = pltpu.roll(inp, (-s) % L, 1) * mask_ref[m:m + 1, :]
            m += 1
        col_ref[pl.ds(k * C_in, C_in), :] = xs.astype(col_ref.dtype)
    acc = jnp.dot(w_ref[...], col_ref[...], preferred_element_type=jnp.float32)
    return acc + b_ref[...]


def channel_attention_kernel(x_ref, mask_ref, w1_ref, b1_ref, w2_ref, b2_ref,
                             wd1_ref, bd1_ref, wd2_ref, bd2_ref,
                             o_ref, col_ref, *, W, HW, G):
    L = G * HW
    x = x_ref[0]                                                   # (C, L) f32

    # process: conv3x3 -> ReLU -> conv3x3  (2 fused im2col MXU dots)
    h1 = jnp.maximum(
        _conv3x3_fused(x, w1_ref, b1_ref, col_ref, mask_ref, W, L), 0.0)
    res = _conv3x3_fused(h1, w2_ref, b2_ref, col_ref, mask_ref, W, L)

    # Per image: global average pool (lane-axis XLU reduction), conv_du
    # (tiny channel-mixing dots), sigmoid gate broadcast over its HW lanes
    # (VPU), residual add, lane-dense store.
    inv_hw = 1.0 / HW
    for g in range(G):
        lo = g * HW
        res_g = res[:, lo:lo + HW]                                  # (C, HW)
        y_g = jnp.sum(res_g, axis=-1, keepdims=True) * inv_hw       # (C, 1)
        t_g = jnp.maximum(
            jnp.dot(wd1_ref[...], y_g, preferred_element_type=jnp.float32)
            + bd1_ref[...], 0.0)                                    # (Cmid, 1)
        z_g = jax.nn.sigmoid(
            jnp.dot(wd2_ref[...], t_g, preferred_element_type=jnp.float32)
            + bd2_ref[...])                                         # (C, 1)
        o_ref[0, :, pl.ds(lo, HW)] = (
            z_g * res_g + x[:, lo:lo + HW]).astype(o_ref.dtype)


def _tensorcores_per_chip():
    try:
        kind = jax.devices()[0].device_kind.lower()
        if "v7" in kind:
            return 2
    except Exception:
        pass
    return 1


def channel_attention(x_nchw, w1, b1, w2, b2, wd1, bd1, wd2, bd2, *,
                      n_groups=None):
    """PyTorch-layout params: w1/w2 (C,C,3,3), b* (C,), wd1 (Cmid,C,1,1),
    wd2 (C,Cmid,1,1)."""
    N, C, H, W = x_nchw.shape
    HW = H * W
    Cmid = wd1.shape[0]

    if n_groups is None:
        n_tc = _tensorcores_per_chip()
        if n_tc == 1:
            n_groups = 1        # whole batch in one grid step on 1-TC v5e/v6e
        else:
            # >= 2 steps per TensorCore so BlockSpec double-buffering can hide
            # the per-step input DMA on dual-TC v7x.
            n_groups = next((g for g in (2 * n_tc, n_tc) if N % g == 0), 1)
    assert N % n_groups == 0
    G = N // n_groups
    L = G * HW

    # ---- Trace-time boundary masks, passed as a kernel input (8, L). ----
    p = np.arange(L)
    q = p % HW                # flattened spatial index within its image
    row, col = q // W, q % W
    mask_rows = []
    for oh, ow in _TAPS:
        if oh == 0 and ow == 0:
            continue
        valid = ((row + oh >= 0) & (row + oh < H) &
                 (col + ow >= 0) & (col + ow < W))
        mask_rows.append(valid.astype(np.float32))
    masks = jnp.asarray(np.stack(mask_rows, axis=0))               # (8, L)

    # ---- Parameters in kernel layout.  Fused 3x3 weights: (O, I, kh, kw) ->
    # (O, kh, kw, I) -> (O, 9*I) bf16; column index (kh*3+kw)*C + i matches
    # the im2col stack order in _conv3x3_fused. ----
    w1_f = jnp.transpose(w1, (0, 2, 3, 1)).reshape(C, 9 * C).astype(jnp.bfloat16)
    w2_f = jnp.transpose(w2, (0, 2, 3, 1)).reshape(C, 9 * C).astype(jnp.bfloat16)
    b1_f = b1.reshape(C, 1).astype(jnp.float32)
    b2_f = b2.reshape(C, 1).astype(jnp.float32)
    wd1_f = wd1[:, :, 0, 0].astype(jnp.float32)
    bd1_f = bd1.reshape(Cmid, 1).astype(jnp.float32)
    wd2_f = wd2[:, :, 0, 0].astype(jnp.float32)
    bd2_f = bd2.reshape(C, 1).astype(jnp.float32)

    # Fold G images per group onto the lane axis: (n_groups, C, G*HW).
    x_grp = (x_nchw.reshape(n_groups, G, C, HW)
             .transpose(0, 2, 1, 3)
             .reshape(n_groups, C, L))

    kernel = functools.partial(channel_attention_kernel, W=W, HW=HW, G=G)

    # VMEM budget: bf16 im2col scratch + double-buffered x/out blocks + masks
    # + params, with 2x headroom, floored at the 32 MiB scoped default and
    # capped below v7x's 64 MiB physical VMEM.
    est = ((9 * C) * L * 2                       # im2col scratch (bf16)
           + 2 * 2 * C * L * 4                   # double-buffered x and out
           + 2 * 8 * L * 4                       # masks
           + 2 * (2 * C * 9 * C * 2              # bf16 conv weights
                  + (2 * C + Cmid + C) * 4       # biases
                  + 2 * Cmid * C * 4))           # du weights
    vmem_limit = int(min(max(2 * est + (1 << 20), 32 << 20), 64 << 20))

    out = pl.pallas_call(
        kernel,
        out_shape=jax.ShapeDtypeStruct((n_groups, C, L), x_nchw.dtype),
        grid_spec=pltpu.PrefetchScalarGridSpec(
            num_scalar_prefetch=0,
            grid=(n_groups,),
            in_specs=[
                pl.BlockSpec((1, C, L), lambda n: (n, 0, 0)),     # x (per group)
                pl.BlockSpec((8, L), lambda n: (0, 0)),           # boundary masks
                pl.BlockSpec((C, 9 * C), lambda n: (0, 0)),       # conv1 fused w (bf16)
                pl.BlockSpec((C, 1), lambda n: (0, 0)),           # conv1 b
                pl.BlockSpec((C, 9 * C), lambda n: (0, 0)),       # conv2 fused w (bf16)
                pl.BlockSpec((C, 1), lambda n: (0, 0)),           # conv2 b
                pl.BlockSpec((Cmid, C), lambda n: (0, 0)),        # du1 w
                pl.BlockSpec((Cmid, 1), lambda n: (0, 0)),        # du1 b
                pl.BlockSpec((C, Cmid), lambda n: (0, 0)),        # du2 w
                pl.BlockSpec((C, 1), lambda n: (0, 0)),           # du2 b
            ],
            out_specs=pl.BlockSpec((1, C, L), lambda n: (n, 0, 0)),
            scratch_shapes=[pltpu.VMEM((9 * C, L), jnp.bfloat16)],  # im2col stack
        ),
        compiler_params=pltpu.CompilerParams(
            dimension_semantics=("parallel",),
            vmem_limit_bytes=vmem_limit),
        # NOTE: input_output_aliases={0: 0} would let the output reuse x_grp's
        # HBM buffer; left off here to avoid donation warnings in eager use.
    )(x_grp, masks, w1_f, b1_f, w2_f, b2_f, wd1_f, bd1_f, wd2_f, bd2_f)

    return (out.reshape(n_groups, C, G, HW)
            .transpose(0, 2, 1, 3)
            .reshape(N, C, H, W))


if __name__ == "__main__":
    N, C, H, W = 4, 8, 16, 16
    reduction = 4
    Cmid = C // reduction

    key = jax.random.PRNGKey(0)
    keys = jax.random.split(key, 9)
    x = jax.random.normal(keys[0], (N, C, H, W), jnp.float32)

    # Deterministic synthetic parameters (PyTorch Conv2d layout: (out, in, kh, kw)).
    w1 = 0.1 * jax.random.normal(keys[1], (C, C, 3, 3), jnp.float32)
    b1 = 0.1 * jax.random.normal(keys[2], (C,), jnp.float32)
    w2 = 0.1 * jax.random.normal(keys[3], (C, C, 3, 3), jnp.float32)
    b2 = 0.1 * jax.random.normal(keys[4], (C,), jnp.float32)
    wd1 = 0.1 * jax.random.normal(keys[5], (Cmid, C, 1, 1), jnp.float32)
    bd1 = 0.1 * jax.random.normal(keys[6], (Cmid,), jnp.float32)
    wd2 = 0.1 * jax.random.normal(keys[7], (C, Cmid, 1, 1), jnp.float32)
    bd2 = 0.1 * jax.random.normal(keys[8], (C,), jnp.float32)

    out = jax.block_until_ready(
        channel_attention(x, w1, b1, w2, b2, wd1, bd1, wd2, bd2))

    # Pure-JAX f32 reference (NCHW, PyTorch semantics).
    dn = ("NCHW", "OIHW", "NCHW")
    res = lax.conv_general_dilated(x, w1, (1, 1), "SAME",
                                   dimension_numbers=dn) + b1.reshape(1, C, 1, 1)
    res = jnp.maximum(res, 0.0)
    res = lax.conv_general_dilated(res, w2, (1, 1), "SAME",
                                   dimension_numbers=dn) + b2.reshape(1, C, 1, 1)
    y = jnp.mean(res, axis=(2, 3), keepdims=True)
    t = jnp.maximum(jnp.einsum("oc,ncij->noij", wd1[:, :, 0, 0], y)
                    + bd1.reshape(1, Cmid, 1, 1), 0.0)
    z = jax.nn.sigmoid(jnp.einsum("oc,ncij->noij", wd2[:, :, 0, 0], t)
                       + bd2.reshape(1, C, 1, 1))
    expected = z * res + x

    # im2col inputs + 3x3 weights are bf16 (accumulation stays f32), so the
    # tolerance is bf16-level; a structural bug would be orders larger.
    np.testing.assert_allclose(np.asarray(out), np.asarray(expected),
                               rtol=3e-2, atol=3e-2)
    print("KERNEL_OK")
</pallas_src>

<mosaic_0001>
module attributes {stable_mosaic.version = 11 : i64} {
  func.func @channel_attention_kernel(%arg0: i32, %arg1: memref<1x8x1024xf32, #tpu.memory_space<vmem>>, %arg2: memref<8x1024xf32, #tpu.memory_space<vmem>>, %arg3: memref<8x72xbf16, #tpu.memory_space<vmem>>, %arg4: memref<8x1xf32, #tpu.memory_space<vmem>>, %arg5: memref<8x72xbf16, #tpu.memory_space<vmem>>, %arg6: memref<8x1xf32, #tpu.memory_space<vmem>>, %arg7: memref<2x8xf32, #tpu.memory_space<vmem>>, %arg8: memref<2x1xf32, #tpu.memory_space<vmem>>, %arg9: memref<8x2xf32, #tpu.memory_space<vmem>>, %arg10: memref<8x1xf32, #tpu.memory_space<vmem>>, %arg11: memref<1x8x1024xf32, #tpu.memory_space<vmem>>, %arg12: memref<72x1024xbf16, #tpu.memory_space<vmem>>) attributes {dimension_semantics = [#tpu.dimension_semantics<parallel>], iteration_bounds = array<i64: 1>, scalar_prefetch = 0 : i64, scratch_operands = 1 : i64, tpu.core_type = #tpu.core_type<tc>, window_params = [{transform_indices = @transform_0, window_bounds = array<i64: 1, 8, 1024>}, {pipeline_mode = #tpu.pipeline_mode<synchronous>, transform_indices = @transform_1, window_bounds = array<i64: 8, 1024>}, {pipeline_mode = #tpu.pipeline_mode<synchronous>, transform_indices = @transform_2, window_bounds = array<i64: 8, 72>}, {pipeline_mode = #tpu.pipeline_mode<synchronous>, transform_indices = @transform_3, window_bounds = array<i64: 8, 1>}, {pipeline_mode = #tpu.pipeline_mode<synchronous>, transform_indices = @transform_4, window_bounds = array<i64: 8, 72>}, {pipeline_mode = #tpu.pipeline_mode<synchronous>, transform_indices = @transform_5, window_bounds = array<i64: 8, 1>}, {pipeline_mode = #tpu.pipeline_mode<synchronous>, transform_indices = @transform_6, window_bounds = array<i64: 2, 8>}, {pipeline_mode = #tpu.pipeline_mode<synchronous>, transform_indices = @transform_7, window_bounds = array<i64: 2, 1>}, {pipeline_mode = #tpu.pipeline_mode<synchronous>, transform_indices = @transform_8, window_bounds = array<i64: 8, 2>}, {pipeline_mode = #tpu.pipeline_mode<synchronous>, transform_indices = @transform_9, window_bounds = array<i64: 8, 1>}, {transform_indices = @transform_10, window_bounds = array<i64: 1, 8, 1024>}]} {
    %c0 = arith.constant 0 : index
    %c0_0 = arith.constant 0 : index
    %c0_1 = arith.constant 0 : index
    %0 = vector.load %arg1[%c0, %c0_0, %c0_1] : memref<1x8x1024xf32, #tpu.memory_space<vmem>>, vector<1x8x1024xf32>
    %1 = vector.shape_cast %0 : vector<1x8x1024xf32> to vector<8x1024xf32>
    %c17_i32 = arith.constant 17 : i32
    %2 = tpu.dynamic_rotate %1 by %c17_i32 dim 1 : vector<8x1024xf32>, i32 -> vector<8x1024xf32>
    %c0_2 = arith.constant 0 : index
    %c0_3 = arith.constant 0 : index
    %3 = vector.load %arg2[%c0_2, %c0_3] : memref<8x1024xf32, #tpu.memory_space<vmem>>, vector<1x1024xf32>
    %4 = vector.broadcast %3 : vector<1x1024xf32> to vector<8x1024xf32>
    %5 = arith.mulf %2, %4 : vector<8x1024xf32>
    %6 = arith.truncf %5 : vector<8x1024xf32> to vector<8x1024xbf16>
    %c0_4 = arith.constant 0 : index
    %c0_5 = arith.constant 0 : index
    %7 = vector.load %arg12[%c0_4, %c0_5] : memref<72x1024xbf16, #tpu.memory_space<vmem>>, vector<8x1024xbf16>
    tpu.vector_store %arg12[%c0_4, %c0_5], %6 {strides = array<i32>} : memref<72x1024xbf16, #tpu.memory_space<vmem>>, vector<8x1024xbf16>,
    %c16_i32 = arith.constant 16 : i32
    %8 = tpu.dynamic_rotate %1 by %c16_i32 dim 1 : vector<8x1024xf32>, i32 -> vector<8x1024xf32>
    %c1 = arith.constant 1 : index
    %c0_6 = arith.constant 0 : index
    %9 = vector.load %arg2[%c1, %c0_6] : memref<8x1024xf32, #tpu.memory_space<vmem>>, vector<1x1024xf32>
    %10 = vector.broadcast %9 : vector<1x1024xf32> to vector<8x1024xf32>
    %11 = arith.mulf %8, %10 : vector<8x1024xf32>
    %12 = arith.truncf %11 : vector<8x1024xf32> to vector<8x1024xbf16>
    %c8 = arith.constant 8 : index
    %c0_7 = arith.constant 0 : index
    %13 = vector.load %arg12[%c8, %c0_7] : memref<72x1024xbf16, #tpu.memory_space<vmem>>, vector<8x1024xbf16>
    tpu.vector_store %arg12[%c8, %c0_7], %12 {strides = array<i32>} : memref<72x1024xbf16, #tpu.memory_space<vmem>>, vector<8x1024xbf16>,
    %c15_i32 = arith.constant 15 : i32
    %14 = tpu.dynamic_rotate %1 by %c15_i32 dim 1 : vector<8x1024xf32>, i32 -> vector<8x1024xf32>
    %c2 = arith.constant 2 : index
    %c0_8 = arith.constant 0 : index
    %15 = vector.load %arg2[%c2, %c0_8] : memref<8x1024xf32, #tpu.memory_space<vmem>>, vector<1x1024xf32>
    %16 = vector.broadcast %15 : vector<1x1024xf32> to vector<8x1024xf32>
    %17 = arith.mulf %14, %16 : vector<8x1024xf32>
    %18 = arith.truncf %17 : vector<8x1024xf32> to vector<8x1024xbf16>
    %c16 = arith.constant 16 : index
    %c0_9 = arith.constant 0 : index
    %19 = vector.load %arg12[%c16, %c0_9] : memref<72x1024xbf16, #tpu.memory_space<vmem>>, vector<8x1024xbf16>
    tpu.vector_store %arg12[%c16, %c0_9], %18 {strides = array<i32>} : memref<72x1024xbf16, #tpu.memory_space<vmem>>, vector<8x1024xbf16>,
    %c1_i32 = arith.constant 1 : i32
    %20 = tpu.dynamic_rotate %1 by %c1_i32 dim 1 : vector<8x1024xf32>, i32 -> vector<8x1024xf32>
    %c3 = arith.constant 3 : index
    %c0_10 = arith.constant 0 : index
    %21 = vector.load %arg2[%c3, %c0_10] : memref<8x1024xf32, #tpu.memory_space<vmem>>, vector<1x1024xf32>
    %22 = vector.broadcast %21 : vector<1x1024xf32> to vector<8x1024xf32>
    %23 = arith.mulf %20, %22 : vector<8x1024xf32>
    %24 = arith.truncf %23 : vector<8x1024xf32> to vector<8x1024xbf16>
    %c24 = arith.constant 24 : index
    %c0_11 = arith.constant 0 : index
    %25 = vector.load %arg12[%c24, %c0_11] : memref<72x1024xbf16, #tpu.memory_space<vmem>>, vector<8x1024xbf16>
    tpu.vector_store %arg12[%c24, %c0_11], %24 {strides = array<i32>} : memref<72x1024xbf16, #tpu.memory_space<vmem>>, vector<8x1024xbf16>,
    %26 = arith.truncf %1 : vector<8x1024xf32> to vector<8x1024xbf16>
    %c32 = arith.constant 32 : index
    %c0_12 = arith.constant 0 : index
    %27 = vector.load %arg12[%c32, %c0_12] : memref<72x1024xbf16, #tpu.memory_space<vmem>>, vector<8x1024xbf16>
    tpu.vector_store %arg12[%c32, %c0_12], %26 {strides = array<i32>} : memref<72x1024xbf16, #tpu.memory_space<vmem>>, vector<8x1024xbf16>,
    %c1023_i32 = arith.constant 1023 : i32
    %28 = tpu.dynamic_rotate %1 by %c1023_i32 dim 1 : vector<8x1024xf32>, i32 -> vector<8x1024xf32>
    %c4 = arith.constant 4 : index
    %c0_13 = arith.constant 0 : index
    %29 = vector.load %arg2[%c4, %c0_13] : memref<8x1024xf32, #tpu.memory_space<vmem>>, vector<1x1024xf32>
    %30 = vector.broadcast %29 : vector<1x1024xf32> to vector<8x1024xf32>
    %31 = arith.mulf %28, %30 : vector<8x1024xf32>
    %32 = arith.truncf %31 : vector<8x1024xf32> to vector<8x1024xbf16>
    %c40 = arith.constant 40 : index
    %c0_14 = arith.constant 0 : index
    %33 = vector.load %arg12[%c40, %c0_14] : memref<72x1024xbf16, #tpu.memory_space<vmem>>, vector<8x1024xbf16>
    tpu.vector_store %arg12[%c40, %c0_14], %32 {strides = array<i32>} : memref<72x1024xbf16, #tpu.memory_space<vmem>>, vector<8x1024xbf16>,
    %c1009_i32 = arith.constant 1009 : i32
    %34 = tpu.dynamic_rotate %1 by %c1009_i32 dim 1 : vector<8x1024xf32>, i32 -> vector<8x1024xf32>
    %c5 = arith.constant 5 : index
    %c0_15 = arith.constant 0 : index
    %35 = vector.load %arg2[%c5, %c0_15] : memref<8x1024xf32, #tpu.memory_space<vmem>>, vector<1x1024xf32>
    %36 = vector.broadcast %35 : vector<1x1024xf32> to vector<8x1024xf32>
    %37 = arith.mulf %34, %36 : vector<8x1024xf32>
    %38 = arith.truncf %37 : vector<8x1024xf32> to vector<8x1024xbf16>
    %c48 = arith.constant 48 : index
    %c0_16 = arith.constant 0 : index
    %39 = vector.load %arg12[%c48, %c0_16] : memref<72x1024xbf16, #tpu.memory_space<vmem>>, vector<8x1024xbf16>
    tpu.vector_store %arg12[%c48, %c0_16], %38 {strides = array<i32>} : memref<72x1024xbf16, #tpu.memory_space<vmem>>, vector<8x1024xbf16>,
    %c1008_i32 = arith.constant 1008 : i32
    %40 = tpu.dynamic_rotate %1 by %c1008_i32 dim 1 : vector<8x1024xf32>, i32 -> vector<8x1024xf32>
    %c6 = arith.constant 6 : index
    %c0_17 = arith.constant 0 : index
    %41 = vector.load %arg2[%c6, %c0_17] : memref<8x1024xf32, #tpu.memory_space<vmem>>, vector<1x1024xf32>
    %42 = vector.broadcast %41 : vector<1x1024xf32> to vector<8x1024xf32>
    %43 = arith.mulf %40, %42 : vector<8x1024xf32>
    %44 = arith.truncf %43 : vector<8x1024xf32> to vector<8x1024xbf16>
    %c56 = arith.constant 56 : index
    %c0_18 = arith.constant 0 : index
    %45 = vector.load %arg12[%c56, %c0_18] : memref<72x1024xbf16, #tpu.memory_space<vmem>>, vector<8x1024xbf16>
    tpu.vector_store %arg12[%c56, %c0_18], %44 {strides = array<i32>} : memref<72x1024xbf16, #tpu.memory_space<vmem>>, vector<8x1024xbf16>,
    %c1007_i32 = arith.constant 1007 : i32
    %46 = tpu.dynamic_rotate %1 by %c1007_i32 dim 1 : vector<8x1024xf32>, i32 -> vector<8x1024xf32>
    %c7 = arith.constant 7 : index
    %c0_19 = arith.constant 0 : index
    %47 = vector.load %arg2[%c7, %c0_19] : memref<8x1024xf32, #tpu.memory_space<vmem>>, vector<1x1024xf32>
    %48 = vector.broadcast %47 : vector<1x1024xf32> to vector<8x1024xf32>
    %49 = arith.mulf %46, %48 : vector<8x1024xf32>
    %50 = arith.truncf %49 : vector<8x1024xf32> to vector<8x1024xbf16>
    %c64 = arith.constant 64 : index
    %c0_20 = arith.constant 0 : index
    %51 = vector.load %arg12[%c64, %c0_20] : memref<72x1024xbf16, #tpu.memory_space<vmem>>, vector<8x1024xbf16>
    tpu.vector_store %arg12[%c64, %c0_20], %50 {strides = array<i32>} : memref<72x1024xbf16, #tpu.memory_space<vmem>>, vector<8x1024xbf16>,
    %c0_21 = arith.constant 0 : index
    %c0_22 = arith.constant 0 : index
    %52 = vector.load %arg3[%c0_21, %c0_22] : memref<8x72xbf16, #tpu.memory_space<vmem>>, vector<8x72xbf16>
    %c0_23 = arith.constant 0 : index
    %c0_24 = arith.constant 0 : index
    %53 = vector.load %arg12[%c0_23, %c0_24] : memref<72x1024xbf16, #tpu.memory_space<vmem>>, vector<72x1024xbf16>
    %cst = arith.constant dense<0.000000e+00> : vector<8x1024xf32>
    %54 = tpu.matmul %52, %53, %cst {dimension_numbers = #tpu.dot_dimension_numbers<[1], [0], [0], [1], [0, 0, 1, 1], [], []>} : vector<8x72xbf16>, vector<72x1024xbf16>, vector<8x1024xf32> -> vector<8x1024xf32>
    %c0_25 = arith.constant 0 : index
    %c0_26 = arith.constant 0 : index
    %55 = vector.load %arg4[%c0_25, %c0_26] : memref<8x1xf32, #tpu.memory_space<vmem>>, vector<8x1xf32>
    %56 = vector.broadcast %55 : vector<8x1xf32> to vector<8x1024xf32>
    %57 = arith.addf %54, %56 : vector<8x1024xf32>
    %cst_27 = arith.constant 0.000000e+00 : f32
    %58 = vector.broadcast %cst_27 : f32 to vector<8x1024xf32>
    %59 = arith.maximumf %57, %58 : vector<8x1024xf32>
    %c17_i32_28 = arith.constant 17 : i32
    %60 = tpu.dynamic_rotate %59 by %c17_i32_28 dim 1 : vector<8x1024xf32>, i32 -> vector<8x1024xf32>
    %c0_29 = arith.constant 0 : index
    %c0_30 = arith.constant 0 : index
    %61 = vector.load %arg2[%c0_29, %c0_30] : memref<8x1024xf32, #tpu.memory_space<vmem>>, vector<1x1024xf32>
    %62 = vector.broadcast %61 : vector<1x1024xf32> to vector<8x1024xf32>
    %63 = arith.mulf %60, %62 : vector<8x1024xf32>
    %64 = arith.truncf %63 : vector<8x1024xf32> to vector<8x1024xbf16>
    %c0_31 = arith.constant 0 : index
    %c0_32 = arith.constant 0 : index
    %65 = vector.load %arg12[%c0_31, %c0_32] : memref<72x1024xbf16, #tpu.memory_space<vmem>>, vector<8x1024xbf16>
    tpu.vector_store %arg12[%c0_31, %c0_32], %64 {strides = array<i32>} : memref<72x1024xbf16, #tpu.memory_space<vmem>>, vector<8x1024xbf16>,
    %c16_i32_33 = arith.constant 16 : i32
    %66 = tpu.dynamic_rotate %59 by %c16_i32_33 dim 1 : vector<8x1024xf32>, i32 -> vector<8x1024xf32>
    %c1_34 = arith.constant 1 : index
    %c0_35 = arith.constant 0 : index
    %67 = vector.load %arg2[%c1_34, %c0_35] : memref<8x1024xf32, #tpu.memory_space<vmem>>, vector<1x1024xf32>
    %68 = vector.broadcast %67 : vector<1x1024xf32> to vector<8x1024xf32>
    %69 = arith.mulf %66, %68 : vector<8x1024xf32>
    %70 = arith.truncf %69 : vector<8x1024xf32> to vector<8x1024xbf16>
    %c8_36 = arith.constant 8 : index
    %c0_37 = arith.constant 0 : index
    %71 = vector.load %arg12[%c8_36, %c0_37] : memref<72x1024xbf16, #tpu.memory_space<vmem>>, vector<8x1024xbf16>
    tpu.vector_store %arg12[%c8_36, %c0_37], %70 {strides = array<i32>} : memref<72x1024xbf16, #tpu.memory_space<vmem>>, vector<8x1024xbf16>,
    %c15_i32_38 = arith.constant 15 : i32
    %72 = tpu.dynamic_rotate %59 by %c15_i32_38 dim 1 : vector<8x1024xf32>, i32 -> vector<8x1024xf32>
    %c2_39 = arith.constant 2 : index
    %c0_40 = arith.constant 0 : index
    %73 = vector.load %arg2[%c2_39, %c0_40] : memref<8x1024xf32, #tpu.memory_space<vmem>>, vector<1x1024xf32>
    %74 = vector.broadcast %73 : vector<1x1024xf32> to vector<8x1024xf32>
    %75 = arith.mulf %72, %74 : vector<8x1024xf32>
    %76 = arith.truncf %75 : vector<8x1024xf32> to vector<8x1024xbf16>
    %c16_41 = arith.constant 16 : index
    %c0_42 = arith.constant 0 : index
    %77 = vector.load %arg12[%c16_41, %c0_42] : memref<72x1024xbf16, #tpu.memory_space<vmem>>, vector<8x1024xbf16>
    tpu.vector_store %arg12[%c16_41, %c0_42], %76 {strides = array<i32>} : memref<72x1024xbf16, #tpu.memory_space<vmem>>, vector<8x1024xbf16>,
    %c1_i32_43 = arith.constant 1 : i32
    %78 = tpu.dynamic_rotate %59 by %c1_i32_43 dim 1 : vector<8x1024xf32>, i32 -> vector<8x1024xf32>
    %c3_44 = arith.constant 3 : index
    %c0_45 = arith.constant 0 : index
    %79 = vector.load %arg2[%c3_44, %c0_45] : memref<8x1024xf32, #tpu.memory_space<vmem>>, vector<1x1024xf32>
    %80 = vector.broadcast %79 : vector<1x1024xf32> to vector<8x1024xf32>
    %81 = arith.mulf %78, %80 : vector<8x1024xf32>
    %82 = arith.truncf %81 : vector<8x1024xf32> to vector<8x1024xbf16>
    %c24_46 = arith.constant 24 : index
    %c0_47 = arith.constant 0 : index
    %83 = vector.load %arg12[%c24_46, %c0_47] : memref<72x1024xbf16, #tpu.memory_space<vmem>>, vector<8x1024xbf16>
    tpu.vector_store %arg12[%c24_46, %c0_47], %82 {strides = array<i32>} : memref<72x1024xbf16, #tpu.memory_space<vmem>>, vector<8x1024xbf16>,
    %84 = arith.truncf %59 : vector<8x1024xf32> to vector<8x1024xbf16>
    %c32_48 = arith.constant 32 : index
    %c0_49 = arith.constant 0 : index
    %85 = vector.load %arg12[%c32_48, %c0_49] : memref<72x1024xbf16, #tpu.memory_space<vmem>>, vector<8x1024xbf16>
    tpu.vector_store %arg12[%c32_48, %c0_49], %84 {strides = array<i32>} : memref<72x1024xbf16, #tpu.memory_space<vmem>>, vector<8x1024xbf16>,
    %c1023_i32_50 = arith.constant 1023 : i32
    %86 = tpu.dynamic_rotate %59 by %c1023_i32_50 dim 1 : vector<8x1024xf32>, i32 -> vector<8x1024xf32>
    %c4_51 = arith.constant 4 : index
    %c0_52 = arith.constant 0 : index
    %87 = vector.load %arg2[%c4_51, %c0_52] : memref<8x1024xf32, #tpu.memory_space<vmem>>, vector<1x1024xf32>
    %88 = vector.broadcast %87 : vector<1x1024xf32> to vector<8x1024xf32>
    %89 = arith.mulf %86, %88 : vector<8x1024xf32>
    %90 = arith.truncf %89 : vector<8x1024xf32> to vector<8x1024xbf16>
    %c40_53 = arith.constant 40 : index
    %c0_54 = arith.constant 0 : index
    %91 = vector.load %arg12[%c40_53, %c0_54] : memref<72x1024xbf16, #tpu.memory_space<vmem>>, vector<8x1024xbf16>
    tpu.vector_store %arg12[%c40_53, %c0_54], %90 {strides = array<i32>} : memref<72x1024xbf16, #tpu.memory_space<vmem>>, vector<8x1024xbf16>,
    %c1009_i32_55 = arith.constant 1009 : i32
    %92 = tpu.dynamic_rotate %59 by %c1009_i32_55 dim 1 : vector<8x1024xf32>, i32 -> vector<8x1024xf32>
    %c5_56 = arith.constant 5 : index
    %c0_57 = arith.constant 0 : index
    %93 = vector.load %arg2[%c5_56, %c0_57] : memref<8x1024xf32, #tpu.memory_space<vmem>>, vector<1x1024xf32>
    %94 = vector.broadcast %93 : vector<1x1024xf32> to vector<8x1024xf32>
    %95 = arith.mulf %92, %94 : vector<8x1024xf32>
    %96 = arith.truncf %95 : vector<8x1024xf32> to vector<8x1024xbf16>
    %c48_58 = arith.constant 48 : index
    %c0_59 = arith.constant 0 : index
    %97 = vector.load %arg12[%c48_58, %c0_59] : memref<72x1024xbf16, #tpu.memory_space<vmem>>, vector<8x1024xbf16>
    tpu.vector_store %arg12[%c48_58, %c0_59], %96 {strides = array<i32>} : memref<72x1024xbf16, #tpu.memory_space<vmem>>, vector<8x1024xbf16>,
    %c1008_i32_60 = arith.constant 1008 : i32
    %98 = tpu.dynamic_rotate %59 by %c1008_i32_60 dim 1 : vector<8x1024xf32>, i32 -> vector<8x1024xf32>
    %c6_61 = arith.constant 6 : index
    %c0_62 = arith.constant 0 : index
    %99 = vector.load %arg2[%c6_61, %c0_62] : memref<8x1024xf32, #tpu.memory_space<vmem>>, vector<1x1024xf32>
    %100 = vector.broadcast %99 : vector<1x1024xf32> to vector<8x1024xf32>
    %101 = arith.mulf %98, %100 : vector<8x1024xf32>
    %102 = arith.truncf %101 : vector<8x1024xf32> to vector<8x1024xbf16>
    %c56_63 = arith.constant 56 : index
    %c0_64 = arith.constant 0 : index
    %103 = vector.load %arg12[%c56_63, %c0_64] : memref<72x1024xbf16, #tpu.memory_space<vmem>>, vector<8x1024xbf16>
    tpu.vector_store %arg12[%c56_63, %c0_64], %102 {strides = array<i32>} : memref<72x1024xbf16, #tpu.memory_space<vmem>>, vector<8x1024xbf16>,
    %c1007_i32_65 = arith.constant 1007 : i32
    %104 = tpu.dynamic_rotate %59 by %c1007_i32_65 dim 1 : vector<8x1024xf32>, i32 -> vector<8x1024xf32>
    %c7_66 = arith.constant 7 : index
    %c0_67 = arith.constant 0 : index
    %105 = vector.load %arg2[%c7_66, %c0_67] : memref<8x1024xf32, #tpu.memory_space<vmem>>, vector<1x1024xf32>
    %106 = vector.broadcast %105 : vector<1x1024xf32> to vector<8x1024xf32>
    %107 = arith.mulf %104, %106 : vector<8x1024xf32>
    %108 = arith.truncf %107 : vector<8x1024xf32> to vector<8x1024xbf16>
    %c64_68 = arith.constant 64 : index
    %c0_69 = arith.constant 0 : index
    %109 = vector.load %arg12[%c64_68, %c0_69] : memref<72x1024xbf16, #tpu.memory_space<vmem>>, vector<8x1024xbf16>
    tpu.vector_store %arg12[%c64_68, %c0_69], %108 {strides = array<i32>} : memref<72x1024xbf16, #tpu.memory_space<vmem>>, vector<8x1024xbf16>,
    %c0_70 = arith.constant 0 : index
    %c0_71 = arith.constant 0 : index
    %110 = vector.load %arg5[%c0_70, %c0_71] : memref<8x72xbf16, #tpu.memory_space<vmem>>, vector<8x72xbf16>
    %c0_72 = arith.constant 0 : index
    %c0_73 = arith.constant 0 : index
    %111 = vector.load %arg12[%c0_72, %c0_73] : memref<72x1024xbf16, #tpu.memory_space<vmem>>, vector<72x1024xbf16>
    %cst_74 = arith.constant dense<0.000000e+00> : vector<8x1024xf32>
    %112 = tpu.matmul %110, %111, %cst_74 {dimension_numbers = #tpu.dot_dimension_numbers<[1], [0], [0], [1], [0, 0, 1, 1], [], []>} : vector<8x72xbf16>, vector<72x1024xbf16>, vector<8x1024xf32> -> vector<8x1024xf32>
    %c0_75 = arith.constant 0 : index
    %c0_76 = arith.constant 0 : index
    %113 = vector.load %arg6[%c0_75, %c0_76] : memref<8x1xf32, #tpu.memory_space<vmem>>, vector<8x1xf32>
    %114 = vector.broadcast %113 : vector<8x1xf32> to vector<8x1024xf32>
    %115 = arith.addf %112, %114 : vector<8x1024xf32>
    %116 = vector.extract_strided_slice %115 {offsets = [0, 0], sizes = [8, 256], strides = [1, 1]} : vector<8x1024xf32> to vector<8x256xf32>
    %cst_77 = arith.constant dense<0.000000e+00> : vector<8xf32>
    %117 = vector.multi_reduction <add>, %116, %cst_77 [1] : vector<8x256xf32> to vector<8xf32>
    %118 = vector.shape_cast %117 : vector<8xf32> to vector<8x1xf32>
    %cst_78 = arith.constant 3.906250e-03 : f32
    %119 = vector.broadcast %cst_78 : f32 to vector<8x1xf32>
    %120 = arith.mulf %118, %119 : vector<8x1xf32>
    %c0_79 = arith.constant 0 : index
    %c0_80 = arith.constant 0 : index
    %121 = vector.load %arg7[%c0_79, %c0_80] : memref<2x8xf32, #tpu.memory_space<vmem>>, vector<2x8xf32>
    %cst_81 = arith.constant dense<0.000000e+00> : vector<2x1xf32>
    %122 = tpu.matmul %121, %120, %cst_81 {dimension_numbers = #tpu.dot_dimension_numbers<[1], [0], [0], [1], [0, 0, 1, 1], [], []>} : vector<2x8xf32>, vector<8x1xf32>, vector<2x1xf32> -> vector<2x1xf32>
    %c0_82 = arith.constant 0 : index
    %c0_83 = arith.constant 0 : index
    %123 = vector.load %arg8[%c0_82, %c0_83] : memref<2x1xf32, #tpu.memory_space<vmem>>, vector<2x1xf32>
    %124 = arith.addf %122, %123 : vector<2x1xf32>
    %cst_84 = arith.constant 0.000000e+00 : f32
    %125 = vector.broadcast %cst_84 : f32 to vector<2x1xf32>
    %126 = arith.maximumf %124, %125 : vector<2x1xf32>
    %c0_85 = arith.constant 0 : index
    %c0_86 = arith.constant 0 : index
    %127 = vector.load %arg9[%c0_85, %c0_86] : memref<8x2xf32, #tpu.memory_space<vmem>>, vector<8x2xf32>
    %cst_87 = arith.constant dense<0.000000e+00> : vector<8x1xf32>
    %128 = tpu.matmul %127, %126, %cst_87 {dimension_numbers = #tpu.dot_dimension_numbers<[1], [0], [0], [1], [0, 0, 1, 1], [], []>} : vector<8x2xf32>, vector<2x1xf32>, vector<8x1xf32> -> vector<8x1xf32>
    %c0_88 = arith.constant 0 : index
    %c0_89 = arith.constant 0 : index
    %129 = vector.load %arg10[%c0_88, %c0_89] : memref<8x1xf32, #tpu.memory_space<vmem>>, vector<8x1xf32>
    %130 = arith.addf %128, %129 : vector<8x1xf32>
    %131 = arith.negf %130 : vector<8x1xf32>
    %132 = math.exp %131 : vector<8x1xf32>
    %cst_90 = arith.constant 1.000000e+00 : f32
    %133 = vector.broadcast %cst_90 : f32 to vector<8x1xf32>
    %134 = arith.addf %133, %132 : vector<8x1xf32>
    %135 = arith.divf %133, %134 : vector<8x1xf32>
    %136 = vector.broadcast %135 : vector<8x1xf32> to vector<8x256xf32>
    %137 = arith.mulf %136, %116 : vector<8x256xf32>
    %138 = vector.extract_strided_slice %1 {offsets = [0, 0], sizes = [8, 256], strides = [1, 1]} : vector<8x1024xf32> to vector<8x256xf32>
    %139 = arith.addf %137, %138 : vector<8x256xf32>
    %c0_91 = arith.constant 0 : index
    %c0_92 = arith.constant 0 : index
    %c0_93 = arith.constant 0 : index
    %140 = vector.load %arg11[%c0_91, %c0_92, %c0_93] : memref<1x8x1024xf32, #tpu.memory_space<vmem>>, vector<1x8x256xf32>
    %141 = vector.shape_cast %140 : vector<1x8x256xf32> to vector<8x256xf32>
    %142 = vector.shape_cast %139 : vector<8x256xf32> to vector<1x8x256xf32>
    tpu.vector_store %arg11[%c0_91, %c0_92, %c0_93], %142 {strides = array<i32>} : memref<1x8x1024xf32, #tpu.memory_space<vmem>>, vector<1x8x256xf32>,
    %143 = vector.extract_strided_slice %115 {offsets = [0, 256], sizes = [8, 256], strides = [1, 1]} : vector<8x1024xf32> to vector<8x256xf32>
    %cst_94 = arith.constant dense<0.000000e+00> : vector<8xf32>
    %144 = vector.multi_reduction <add>, %143, %cst_94 [1] : vector<8x256xf32> to vector<8xf32>
    %145 = vector.shape_cast %144 : vector<8xf32> to vector<8x1xf32>
    %cst_95 = arith.constant 3.906250e-03 : f32
    %146 = vector.broadcast %cst_95 : f32 to vector<8x1xf32>
    %147 = arith.mulf %145, %146 : vector<8x1xf32>
    %c0_96 = arith.constant 0 : index
    %c0_97 = arith.constant 0 : index
    %148 = vector.load %arg7[%c0_96, %c0_97] : memref<2x8xf32, #tpu.memory_space<vmem>>, vector<2x8xf32>
    %cst_98 = arith.constant dense<0.000000e+00> : vector<2x1xf32>
    %149 = tpu.matmul %148, %147, %cst_98 {dimension_numbers = #tpu.dot_dimension_numbers<[1], [0], [0], [1], [0, 0, 1, 1], [], []>} : vector<2x8xf32>, vector<8x1xf32>, vector<2x1xf32> -> vector<2x1xf32>
    %c0_99 = arith.constant 0 : index
    %c0_100 = arith.constant 0 : index
    %150 = vector.load %arg8[%c0_99, %c0_100] : memref<2x1xf32, #tpu.memory_space<vmem>>, vector<2x1xf32>
    %151 = arith.addf %149, %150 : vector<2x1xf32>
    %cst_101 = arith.constant 0.000000e+00 : f32
    %152 = vector.broadcast %cst_101 : f32 to vector<2x1xf32>
    %153 = arith.maximumf %151, %152 : vector<2x1xf32>
    %c0_102 = arith.constant 0 : index
    %c0_103 = arith.constant 0 : index
    %154 = vector.load %arg9[%c0_102, %c0_103] : memref<8x2xf32, #tpu.memory_space<vmem>>, vector<8x2xf32>
    %cst_104 = arith.constant dense<0.000000e+00> : vector<8x1xf32>
    %155 = tpu.matmul %154, %153, %cst_104 {dimension_numbers = #tpu.dot_dimension_numbers<[1], [0], [0], [1], [0, 0, 1, 1], [], []>} : vector<8x2xf32>, vector<2x1xf32>, vector<8x1xf32> -> vector<8x1xf32>
    %c0_105 = arith.constant 0 : index
    %c0_106 = arith.constant 0 : index
    %156 = vector.load %arg10[%c0_105, %c0_106] : memref<8x1xf32, #tpu.memory_space<vmem>>, vector<8x1xf32>
    %157 = arith.addf %155, %156 : vector<8x1xf32>
    %158 = arith.negf %157 : vector<8x1xf32>
    %159 = math.exp %158 : vector<8x1xf32>
    %cst_107 = arith.constant 1.000000e+00 : f32
    %160 = vector.broadcast %cst_107 : f32 to vector<8x1xf32>
    %161 = arith.addf %160, %159 : vector<8x1xf32>
    %162 = arith.divf %160, %161 : vector<8x1xf32>
    %163 = vector.broadcast %162 : vector<8x1xf32> to vector<8x256xf32>
    %164 = arith.mulf %163, %143 : vector<8x256xf32>
    %165 = vector.extract_strided_slice %1 {offsets = [0, 256], sizes = [8, 256], strides = [1, 1]} : vector<8x1024xf32> to vector<8x256xf32>
    %166 = arith.addf %164, %165 : vector<8x256xf32>
    %c0_108 = arith.constant 0 : index
    %c0_109 = arith.constant 0 : index
    %c256 = arith.constant 256 : index
    %167 = vector.load %arg11[%c0_108, %c0_109, %c256] : memref<1x8x1024xf32, #tpu.memory_space<vmem>>, vector<1x8x256xf32>
    %168 = vector.shape_cast %167 : vector<1x8x256xf32> to vector<8x256xf32>
    %169 = vector.shape_cast %166 : vector<8x256xf32> to vector<1x8x256xf32>
    tpu.vector_store %arg11[%c0_108, %c0_109, %c256], %169 {strides = array<i32>} : memref<1x8x1024xf32, #tpu.memory_space<vmem>>, vector<1x8x256xf32>,
    %170 = vector.extract_strided_slice %115 {offsets = [0, 512], sizes = [8, 256], strides = [1, 1]} : vector<8x1024xf32> to vector<8x256xf32>
    %cst_110 = arith.constant dense<0.000000e+00> : vector<8xf32>
    %171 = vector.multi_reduction <add>, %170, %cst_110 [1] : vector<8x256xf32> to vector<8xf32>
    %172 = vector.shape_cast %171 : vector<8xf32> to vector<8x1xf32>
    %cst_111 = arith.constant 3.906250e-03 : f32
    %173 = vector.broadcast %cst_111 : f32 to vector<8x1xf32>
    %174 = arith.mulf %172, %173 : vector<8x1xf32>
    %c0_112 = arith.constant 0 : index
    %c0_113 = arith.constant 0 : index
    %175 = vector.load %arg7[%c0_112, %c0_113] : memref<2x8xf32, #tpu.memory_space<vmem>>, vector<2x8xf32>
    %cst_114 = arith.constant dense<0.000000e+00> : vector<2x1xf32>
    %176 = tpu.matmul %175, %174, %cst_114 {dimension_numbers = #tpu.dot_dimension_numbers<[1], [0], [0], [1], [0, 0, 1, 1], [], []>} : vector<2x8xf32>, vector<8x1xf32>, vector<2x1xf32> -> vector<2x1xf32>
    %c0_115 = arith.constant 0 : index
    %c0_116 = arith.constant 0 : index
    %177 = vector.load %arg8[%c0_115, %c0_116] : memref<2x1xf32, #tpu.memory_space<vmem>>, vector<2x1xf32>
    %178 = arith.addf %176, %177 : vector<2x1xf32>
    %cst_117 = arith.constant 0.000000e+00 : f32
    %179 = vector.broadcast %cst_117 : f32 to vector<2x1xf32>
    %180 = arith.maximumf %178, %179 : vector<2x1xf32>
    %c0_118 = arith.constant 0 : index
    %c0_119 = arith.constant 0 : index
    %181 = vector.load %arg9[%c0_118, %c0_119] : memref<8x2xf32, #tpu.memory_space<vmem>>, vector<8x2xf32>
    %cst_120 = arith.constant dense<0.000000e+00> : vector<8x1xf32>
    %182 = tpu.matmul %181, %180, %cst_120 {dimension_numbers = #tpu.dot_dimension_numbers<[1], [0], [0], [1], [0, 0, 1, 1], [], []>} : vector<8x2xf32>, vector<2x1xf32>, vector<8x1xf32> -> vector<8x1xf32>
    %c0_121 = arith.constant 0 : index
    %c0_122 = arith.constant 0 : index
    %183 = vector.load %arg10[%c0_121, %c0_122] : memref<8x1xf32, #tpu.memory_space<vmem>>, vector<8x1xf32>
    %184 = arith.addf %182, %183 : vector<8x1xf32>
    %185 = arith.negf %184 : vector<8x1xf32>
    %186 = math.exp %185 : vector<8x1xf32>
    %cst_123 = arith.constant 1.000000e+00 : f32
    %187 = vector.broadcast %cst_123 : f32 to vector<8x1xf32>
    %188 = arith.addf %187, %186 : vector<8x1xf32>
    %189 = arith.divf %187, %188 : vector<8x1xf32>
    %190 = vector.broadcast %189 : vector<8x1xf32> to vector<8x256xf32>
    %191 = arith.mulf %190, %170 : vector<8x256xf32>
    %192 = vector.extract_strided_slice %1 {offsets = [0, 512], sizes = [8, 256], strides = [1, 1]} : vector<8x1024xf32> to vector<8x256xf32>
    %193 = arith.addf %191, %192 : vector<8x256xf32>
    %c0_124 = arith.constant 0 : index
    %c0_125 = arith.constant 0 : index
    %c512 = arith.constant 512 : index
    %194 = vector.load %arg11[%c0_124, %c0_125, %c512] : memref<1x8x1024xf32, #tpu.memory_space<vmem>>, vector<1x8x256xf32>
    %195 = vector.shape_cast %194 : vector<1x8x256xf32> to vector<8x256xf32>
    %196 = vector.shape_cast %193 : vector<8x256xf32> to vector<1x8x256xf32>
    tpu.vector_store %arg11[%c0_124, %c0_125, %c512], %196 {strides = array<i32>} : memref<1x8x1024xf32, #tpu.memory_space<vmem>>, vector<1x8x256xf32>,
    %197 = vector.extract_strided_slice %115 {offsets = [0, 768], sizes = [8, 256], strides = [1, 1]} : vector<8x1024xf32> to vector<8x256xf32>
    %cst_126 = arith.constant dense<0.000000e+00> : vector<8xf32>
    %198 = vector.multi_reduction <add>, %197, %cst_126 [1] : vector<8x256xf32> to vector<8xf32>
    %199 = vector.shape_cast %198 : vector<8xf32> to vector<8x1xf32>
    %cst_127 = arith.constant 3.906250e-03 : f32
    %200 = vector.broadcast %cst_127 : f32 to vector<8x1xf32>
    %201 = arith.mulf %199, %200 : vector<8x1xf32>
    %c0_128 = arith.constant 0 : index
    %c0_129 = arith.constant 0 : index
    %202 = vector.load %arg7[%c0_128, %c0_129] : memref<2x8xf32, #tpu.memory_space<vmem>>, vector<2x8xf32>
    %cst_130 = arith.constant dense<0.000000e+00> : vector<2x1xf32>
    %203 = tpu.matmul %202, %201, %cst_130 {dimension_numbers = #tpu.dot_dimension_numbers<[1], [0], [0], [1], [0, 0, 1, 1], [], []>} : vector<2x8xf32>, vector<8x1xf32>, vector<2x1xf32> -> vector<2x1xf32>
    %c0_131 = arith.constant 0 : index
    %c0_132 = arith.constant 0 : index
    %204 = vector.load %arg8[%c0_131, %c0_132] : memref<2x1xf32, #tpu.memory_space<vmem>>, vector<2x1xf32>
    %205 = arith.addf %203, %204 : vector<2x1xf32>
    %cst_133 = arith.constant 0.000000e+00 : f32
    %206 = vector.broadcast %cst_133 : f32 to vector<2x1xf32>
    %207 = arith.maximumf %205, %206 : vector<2x1xf32>
    %c0_134 = arith.constant 0 : index
    %c0_135 = arith.constant 0 : index
    %208 = vector.load %arg9[%c0_134, %c0_135] : memref<8x2xf32, #tpu.memory_space<vmem>>, vector<8x2xf32>
    %cst_136 = arith.constant dense<0.000000e+00> : vector<8x1xf32>
    %209 = tpu.matmul %208, %207, %cst_136 {dimension_numbers = #tpu.dot_dimension_numbers<[1], [0], [0], [1], [0, 0, 1, 1], [], []>} : vector<8x2xf32>, vector<2x1xf32>, vector<8x1xf32> -> vector<8x1xf32>
    %c0_137 = arith.constant 0 : index
    %c0_138 = arith.constant 0 : index
    %210 = vector.load %arg10[%c0_137, %c0_138] : memref<8x1xf32, #tpu.memory_space<vmem>>, vector<8x1xf32>
    %211 = arith.addf %209, %210 : vector<8x1xf32>
    %212 = arith.negf %211 : vector<8x1xf32>
    %213 = math.exp %212 : vector<8x1xf32>
    %cst_139 = arith.constant 1.000000e+00 : f32
    %214 = vector.broadcast %cst_139 : f32 to vector<8x1xf32>
    %215 = arith.addf %214, %213 : vector<8x1xf32>
    %216 = arith.divf %214, %215 : vector<8x1xf32>
    %217 = vector.broadcast %216 : vector<8x1xf32> to vector<8x256xf32>
    %218 = arith.mulf %217, %197 : vector<8x256xf32>
    %219 = vector.extract_strided_slice %1 {offsets = [0, 768], sizes = [8, 256], strides = [1, 1]} : vector<8x1024xf32> to vector<8x256xf32>
    %220 = arith.addf %218, %219 : vector<8x256xf32>
    %c0_140 = arith.constant 0 : index
    %c0_141 = arith.constant 0 : index
    %c768 = arith.constant 768 : index
    %221 = vector.load %arg11[%c0_140, %c0_141, %c768] : memref<1x8x1024xf32, #tpu.memory_space<vmem>>, vector<1x8x256xf32>
    %222 = vector.shape_cast %221 : vector<1x8x256xf32> to vector<8x256xf32>
    %223 = vector.shape_cast %220 : vector<8x256xf32> to vector<1x8x256xf32>
    tpu.vector_store %arg11[%c0_140, %c0_141, %c768], %223 {strides = array<i32>} : memref<1x8x1024xf32, #tpu.memory_space<vmem>>, vector<1x8x256xf32>,
    return
  }
  func.func @transform_0(%arg0: i32) -> (i32, i32, i32) {
    %c0_i32 = arith.constant 0 : i32
    %c0_i32_0 = arith.constant 0 : i32
    %c0_i32_1 = arith.constant 0 : i32
    return %arg0, %c0_i32, %c0_i32_0 : i32, i32, i32
  }
  func.func @transform_1(%arg0: i32) -> (i32, i32) {
    %c0_i32 = arith.constant 0 : i32
    %c0_i32_0 = arith.constant 0 : i32
    %c0_i32_1 = arith.constant 0 : i32
    return %c0_i32, %c0_i32_0 : i32, i32
  }
  func.func @transform_2(%arg0: i32) -> (i32, i32) {
    %c0_i32 = arith.constant 0 : i32
    %c0_i32_0 = arith.constant 0 : i32
    %c0_i32_1 = arith.constant 0 : i32
    return %c0_i32, %c0_i32_0 : i32, i32
  }
  func.func @transform_3(%arg0: i32) -> (i32, i32) {
    %c0_i32 = arith.constant 0 : i32
    %c0_i32_0 = arith.constant 0 : i32
    %c0_i32_1 = arith.constant 0 : i32
    return %c0_i32, %c0_i32_0 : i32, i32
  }
  func.func @transform_4(%arg0: i32) -> (i32, i32) {
    %c0_i32 = arith.constant 0 : i32
    %c0_i32_0 = arith.constant 0 : i32
    %c0_i32_1 = arith.constant 0 : i32
    return %c0_i32, %c0_i32_0 : i32, i32
  }
  func.func @transform_5(%arg0: i32) -> (i32, i32) {
    %c0_i32 = arith.constant 0 : i32
    %c0_i32_0 = arith.constant 0 : i32
    %c0_i32_1 = arith.constant 0 : i32
    return %c0_i32, %c0_i32_0 : i32, i32
  }
  func.func @transform_6(%arg0: i32) -> (i32, i32) {
    %c0_i32 = arith.constant 0 : i32
    %c0_i32_0 = arith.constant 0 : i32
    %c0_i32_1 = arith.constant 0 : i32
    return %c0_i32, %c0_i32_0 : i32, i32
  }
  func.func @transform_7(%arg0: i32) -> (i32, i32) {
    %c0_i32 = arith.constant 0 : i32
    %c0_i32_0 = arith.constant 0 : i32
    %c0_i32_1 = arith.constant 0 : i32
    return %c0_i32, %c0_i32_0 : i32, i32
  }
  func.func @transform_8(%arg0: i32) -> (i32, i32) {
    %c0_i32 = arith.constant 0 : i32
    %c0_i32_0 = arith.constant 0 : i32
    %c0_i32_1 = arith.constant 0 : i32
    return %c0_i32, %c0_i32_0 : i32, i32
  }
  func.func @transform_9(%arg0: i32) -> (i32, i32) {
    %c0_i32 = arith.constant 0 : i32
    %c0_i32_0 = arith.constant 0 : i32
    %c0_i32_1 = arith.constant 0 : i32
    return %c0_i32, %c0_i32_0 : i32, i32
  }
  func.func @transform_10(%arg0: i32) -> (i32, i32, i32) {
    %c0_i32 = arith.constant 0 : i32
    %c0_i32_0 = arith.constant 0 : i32
    %c0_i32_1 = arith.constant 0 : i32
    return %arg0, %c0_i32, %c0_i32_0 : i32, i32, i32
  }
}

</mosaic_0001>

<bundles_post_ra>
// kernel: tpu_custom_call.1
= control target key start
LH: loop header
LB: loop body
LE: loop exit
PB: predicated region body
PF: predicated region fallthrough
CT: control target
= control target key end

     0   :  { %15 = vsyncpa [#allocation4], 0  ;;  %s5427_s0 = inlined_call_operand.hbm [shape: f32[1,8,1024], index: 0, kind: input, shape index: {}]   ;;  %s5428_s1 = inlined_call_operand.hbm [shape: f32[8,1024], index: 1, kind: input, shape index: {}]   ;;  %s5429_s2 = inlined_call_operand.vmem [shape: bf16[8,72], index: 2, kind: input, shape index: {}]   ;;  %s5430_s3 = inlined_call_operand.vmem [shape: f32[8,1], index: 3, kind: input, shape index: {}]   ;;  %s5431_s4 = inlined_call_operand.vmem [shape: bf16[8,72], index: 4, kind: input, shape index: {}]   ;;  %s5432_s5 = inlined_call_operand.vmem [shape: f32[8,1], index: 5, kind: input, shape index: {}]   ;;  %s5433_s6 = inlined_call_operand.vmem [shape: f32[2,8], index: 6, kind: input, shape index: {}]   ;;  %s5434_s7 = inlined_call_operand.vmem [shape: f32[2,1], index: 7, kind: input, shape index: {}]   ;;  %s5435_s8 = inlined_call_operand.vmem [shape: f32[8,2], index: 8, kind: input, shape index: {}]   ;;  %s5436_s9 = inlined_call_operand.vmem [shape: f32[8,1], index: 9, kind: input, shape index: {}]   ;;  %s5437_s10 = inlined_call_operand.hbm [shape: f32[1,8,1024], index: 10, kind: output, shape index: {}]  }
   0x1   :  { %16 = vsyncpa [#allocation7], 0 }
   0x2   :  { %17 = vsyncpa [#allocation5], 0  ;;  %s4005_s13 = smov [#allocation3]   ;;  %s4006_s15 = smov [#allocation6]  }
   0x3   :  { %s24_s14 = sshll.u32 %s4005_s13, 4  ;;  %s34_s16 = sshll.u32 %s4006_s15, 4  ;;  %s25_s14 = int_to_ptr.vmem [resolvable:$true] %s24_s14  ;;  %s35_s16 = int_to_ptr.vmem [resolvable:$true] %s34_s16 }
   0x4   :  { %s3947_s17 = scalar_lea.vmem %s25_s14, 1024  ;;  %p3952_p1 = scmp.lt.s32.totalorder %s25_s14, %s25_s14 }
   0x5   :  { %p3948_p0 = scmp.ne.s32.totalorder %s25_s14, %s3947_s17  ;;  %p3953_p2 = scmp.lt.s32.totalorder %s3947_s17, %s3947_s17 }
   0x7   :  { %p3954_p3 = por %p3953_p2, %p3952_p1 }
   0x9   :  { %p3955_p4 = pnand %p3954_p3, %p3948_p0 }
   0xb   :  { %3958 = shalt.err (!%p3955_p4)
}
   0xc   :  { %27 = dma.hbm_to_vmem [thread:$0]  %s5427_s0, 1024, %s25_s14, [#allocation4]  }
   0xd   :  { %s3967_s20 = scalar_lea.vmem %s35_s16, 1024  ;;  %p3972_p6 = scmp.lt.s32.totalorder %s35_s16, %s35_s16 }
   0xe   :  { %p3968_p5 = scmp.ne.s32.totalorder %s35_s16, %s3967_s20  ;;  %p3973_p7 = scmp.lt.s32.totalorder %s3967_s20, %s3967_s20 }
  0x10   :  { %p3974_p8 = por %p3973_p7, %p3972_p6 }
  0x12   :  { %p3975_p9 = pnand %p3974_p8, %p3968_p5 }
  0x14   :  { %3978 = shalt.err (!%p3975_p9)
}
  0x15   :  { %37 = dma.hbm_to_vmem [thread:$0]  %s5428_s1, 1024, %s35_s16, [#allocation7]  }
  0x16   :  { %3999 = dma.done.wait [#allocation4], 1024  }
  0x17   :  { %4000 = vsyncadd [#allocation4], 4294966272 }
  0x18   :  { %4001 = dma.done.wait [#allocation7], 1024  }
  0x19   :  { %4002 = vsyncadd [#allocation7], 4294966272  ;;  %v4080_v0 = vld [vmem:[#allocation3 + $0x10] sm:$0xff]  ;;  %v4082_v1 = vld [vmem:[#allocation3] sm:$0xff]  ;;  %s4007_s0 = smov 111   ;;  %s4008_s23 = smov 113   ;;  %v85_v9 = vlaneseq }
  0x1a   :  { %908 = vrot.lane.b32.xlu1 %v4080_v0, %s4007_s0  ;;  %904 = vrot.lane.b32.xlu0 %v4082_v1, %s4007_s0  ;;  %v4088_v2 = vld [vmem:[#allocation3 + $0x8] sm:$0xff]  ;;  %s4009_s1 = smov 112   ;;  %v4102_v3 = vld [vmem:[#allocation3 + $0x18] sm:$0xff]  ;;  %v4108_v4 = vld [vmem:[#allocation3 + $0x20] sm:$0xff]  ;;  %s4010_s24 = smov 127   ;;  %v5438_v6 = vmov 0  }
  0x1b   :  { %s4011_s25 = smov 15   ;;  %s4012_s26 = smov 1   ;;  %v4134_v5 = vld [vmem:[#allocation3 + $0x38] sm:$0xff]  ;;  %1302 = vmatprep.mubr.bf16.mxu0 %v5438_v6  ;;  %1343 = vmatprep.mubr.bf16.mxu1 %v5438_v6  ;;  %v4168_v7 = vld [vmem:[#allocation3 + $0x30] sm:$0xff]  ;;  %v4170_v8 = vld [vmem:[#allocation3 + $0x28] sm:$0xff]  ;;  %v4212_v10 = vshrl.u32 %v85_v9, 7 }
  0x1c   :  { %s4013_s27 = smov 17   ;;  %3913 = vset.pattern.permute.xlu0 %v5438_v6  ;;  %3914 = vset.pattern.permute.xlu1 %v5438_v6  ;;  %s4015_s28 = smov 16   ;;  %v930_v11 = vld [vmem:[#allocation6 + $0x7] ss:$8 sm:$0xf]  ;;  %v4214_v13 = vand.u32 127, %v85_v9 }
  0x1d   :  { %v931_v12 = vld [vmem:[#allocation6 + $0x7] ss:$8 sm:$0xf0]  ;;  %v4221_v14 = vsub.s32 1, %v4212_v10  ;;  %v4226_v16 = vsub.s32 0, %v4212_v10  ;;  %vm1245_vm1 = vcmask 1043456  }
  0x1e   :  { %678 = vrot.lane.b32.xlu1 %v4088_v2, %s4008_s23  ;;  %906 = vrot.lane.b32.xlu0 %v4088_v2, %s4007_s0  ;;  %v4223_v15 = vor.u32 %v931_v12, %v930_v11  ;;  %vm920_vm0 = vcmp.lt.s32.totalorder %v4214_v13, 111  ;;  %v702_v19 = vld [vmem:[#allocation6 + $0x5] ss:$8 sm:$0xf]  ;;  %vm692_vm2 = vcmp.lt.s32.totalorder %v4214_v13, 113  ;;  %vm806_vm3 = vcmp.lt.s32.totalorder %v4214_v13, 112 }
  0x1f   :  { %v703_v20 = vld [vmem:[#allocation6 + $0x5] ss:$8 sm:$0xf0]  ;;  %v816_v23 = vld [vmem:[#allocation6 + $0x6] ss:$8 sm:$0xf] }
  0x20   :  { %v941_v21 = vrot.slane %v4223_v15, %v4221_v14  ;;  %v937_v22 = vrot.slane %v4223_v15, %v4226_v16  ;;  %v817_v24 = vld [vmem:[#allocation6 + $0x6] ss:$8 sm:$0xf0]  ;;  %v4242_v28 = vor.u32 %v703_v20, %v702_v19  ;;  %v4266_v40 = vsub.s32 2, %v4212_v10 }
  0x21   :  { %v4250_v32 = vor.u32 %v817_v24, %v816_v23  ;;  %v1055_v42 = vld [vmem:[%s5430_s3] sm:$0xff]  ;;  %v4285_v47 = vsub.s32 3, %v4212_v10  ;;  %vm578_vm4 = vcmp.lt.s32.totalorder %v4214_v13, 127  ;;  %vm314_vm5 = vcmp.lt.s32.totalorder %v4214_v13, 15 }
  0x22   :  { %792 = vrot.lane.b32.xlu1 %v4088_v2, %s4009_s1  ;;  %680 = vrot.lane.b32.xlu0 %v4080_v0, %s4008_s23  ;;  %v713_v37 = vrot.slane %v4242_v28, %v4221_v14  ;;  %v709_v45 = vrot.slane %v4242_v28, %v4226_v16  ;;  %v945_v51 = vrot.slane %v4223_v15, %v4266_v40  ;;  %v588_v53 = vld [vmem:[#allocation6 + $0x4] ss:$8 sm:$0xf]  ;;  %vm428_vm6 = vcmp.lt.s32.totalorder %v4214_v13, 1 }
  0x23   :  { %v827_v39 = vrot.slane %v4250_v32, %v4221_v14  ;;  %v823_v50 = vrot.slane %v4250_v32, %v4226_v16  ;;  %v589_v54 = vld [vmem:[#allocation6 + $0x4] ss:$8 sm:$0xf0]  ;;  %v949_v60 = vrot.slane %v4223_v15, %v4285_v47  ;;  %vm87_vm7 = vcmp.lt.s32.totalorder %v4214_v13, 17 }
  0x24   :  { %v4303_v63 = vor.u32 %v589_v54, %v588_v53  ;;  %vm200_vm8 = vcmp.lt.s32.totalorder %v4214_v13, 16  ;;  %vm1241_vm9 = vcmask 588800   ;;  %vm4017_vm10 = vmmov 0  }
  0x25   :  { %vm2794_vm11 = vcmask 64512   ;;  %vm2875_vm12 = vcmask 1041408   ;;  %vm2871_vm13 = vcmask 15360  }
  0x26   :  { %676 = vrot.lane.b32.xlu1 %v4082_v1, %s4008_s23  ;;  %794 = vrot.lane.b32.xlu0 %v4080_v0, %s4009_s1  ;;  %v595_v20 = vrot.slane %v4303_v63, %v4226_v16 }
  0x2a   :  { %910 = vrot.lane.b32.xlu1 %v4102_v3, %s4007_s0  ;;  %790 = vrot.lane.b32.xlu0 %v4082_v1, %s4009_s1 }
  0x2e   :  { %564 = vrot.lane.b32.xlu1 %v4088_v2, %s4010_s24  ;;  %912 = vrot.lane.b32.xlu0 %v4108_v4, %s4007_s0 }
  0x32   :  { %562 = vrot.lane.b32.xlu1 %v4082_v1, %s4010_s24  ;;  %566 = vrot.lane.b32.xlu0 %v4080_v0, %s4010_s24 }
  0x36   :  { %684 = vrot.lane.b32.xlu1 %v4108_v4, %s4008_s23  ;;  %682 = vrot.lane.b32.xlu0 %v4102_v3, %s4008_s23 }
  0x3a   :  { %798 = vrot.lane.b32.xlu1 %v4108_v4, %s4009_s1  ;;  %796 = vrot.lane.b32.xlu0 %v4102_v3, %s4009_s1 }
  0x3e   :  { %300 = vrot.lane.b32.xlu1 %v4088_v2, %s4011_s25  ;;  %298 = vrot.lane.b32.xlu0 %v4082_v1, %s4011_s25 }
  0x42   :  { %414 = vrot.lane.b32.xlu1 %v4088_v2, %s4012_s26  ;;  %412 = vrot.lane.b32.xlu0 %v4082_v1, %s4012_s26 }
  0x46   :  { %426 = vrot.lane.b32.xlu1 %v4134_v5, %s4012_s26  ;;  %312 = vrot.lane.b32.xlu0 %v4134_v5, %s4011_s25 }
  0x4a   :  { %570 = vrot.lane.b32.xlu1 %v4108_v4, %s4010_s24  ;;  %568 = vrot.lane.b32.xlu0 %v4102_v3, %s4010_s24 }
  0x4e   :  { %71 = vrot.lane.b32.xlu1 %v4088_v2, %s4013_s27  ;;  %69 = vrot.lane.b32.xlu0 %v4082_v1, %s4013_s27 }
  0x52   :  { %186 = vrot.lane.b32.xlu1 %v4088_v2, %s4015_s28  ;;  %184 = vrot.lane.b32.xlu0 %v4082_v1, %s4015_s28 }
  0x56   :  { %198 = vrot.lane.b32.xlu1 %v4134_v5, %s4015_s28  ;;  %83 = vrot.lane.b32.xlu0 %v4134_v5, %s4013_s27 }
  0x5a   :  { %304 = vrot.lane.b32.xlu1 %v4102_v3, %s4011_s25  ;;  %302 = vrot.lane.b32.xlu0 %v4080_v0, %s4011_s25 }
  0x5e   :  { %418 = vrot.lane.b32.xlu1 %v4102_v3, %s4012_s26  ;;  %416 = vrot.lane.b32.xlu0 %v4080_v0, %s4012_s26 }
  0x62   :  { %916 = vrot.lane.b32.xlu1 %v4168_v7, %s4007_s0  ;;  %914 = vrot.lane.b32.xlu0 %v4170_v8, %s4007_s0 }
  0x66   :  { %75 = vrot.lane.b32.xlu1 %v4102_v3, %s4013_s27  ;;  %73 = vrot.lane.b32.xlu0 %v4080_v0, %s4013_s27 }
  0x6a   :  { %190 = vrot.lane.b32.xlu1 %v4102_v3, %s4015_s28  ;;  %188 = vrot.lane.b32.xlu0 %v4080_v0, %s4015_s28 }
  0x6e   :  { %688 = vrot.lane.b32.xlu1 %v4168_v7, %s4008_s23  ;;  %686 = vrot.lane.b32.xlu0 %v4170_v8, %s4008_s23 }
  0x72   :  { %802 = vrot.lane.b32.xlu1 %v4168_v7, %s4009_s1  ;;  %800 = vrot.lane.b32.xlu0 %v4170_v8, %s4009_s1 }
  0x76   :  { %572 = vrot.lane.b32.xlu1 %v4170_v8, %s4010_s24  ;;  %918 = vrot.lane.b32.xlu0 %v4134_v5, %s4007_s0 }
  0x7a   :  { %690 = vrot.lane.b32.xlu1 %v4134_v5, %s4008_s23  ;;  %574 = vrot.lane.b32.xlu0 %v4168_v7, %s4010_s24 }
  0x7e   :  { %306 = vrot.lane.b32.xlu1 %v4108_v4, %s4011_s25  ;;  %804 = vrot.lane.b32.xlu0 %v4134_v5, %s4009_s1 }
  0x82   :  { %420 = vrot.lane.b32.xlu1 %v4108_v4, %s4012_s26  ;;  %308 = vrot.lane.b32.xlu0 %v4170_v8, %s4011_s25 }
  0x86   :  { %576 = vrot.lane.b32.xlu1 %v4134_v5, %s4010_s24  ;;  %422 = vrot.lane.b32.xlu0 %v4170_v8, %s4012_s26 }
  0x8a   :  { %79 = vrot.lane.b32.xlu1 %v4170_v8, %s4013_s27  ;;  %77 = vrot.lane.b32.xlu0 %v4108_v4, %s4013_s27 }
  0x8c   :  { %v909_v17 = vpop.permute.xlu1 %908  ;;  %v4228_v18 = vpop.permute.xlu0 %904 }
  0x8e   :  { %194 = vrot.lane.b32.xlu1 %v4170_v8, %s4015_s28  ;;  %192 = vrot.lane.b32.xlu0 %v4108_v4, %s4015_s28 }
  0x90   :  { %v679_v25 = vpop.permute.xlu1 %678  ;;  %v907_v26 = vpop.permute.xlu0 %906 }
  0x91   :  { %v927_v27 = vsel %vm920_vm0, %v4228_v18, %v907_v26  ;;  %v926_v29 = vsel %vm920_vm0, %v907_v26, %v909_v17 }
  0x92   :  { %424 = vrot.lane.b32.xlu1 %v4168_v7, %s4012_s26  ;;  %310 = vrot.lane.b32.xlu0 %v4168_v7, %s4011_s25  ;;  %v975_v30 = vmul.f32 %v941_v21, %v926_v29  ;;  %v974_v31 = vmul.f32 %v937_v22, %v927_v27  ;;  %v599_v21 = vrot.slane %v4303_v63, %v4221_v14 }
  0x94   :  { %v793_v33 = vpop.permute.xlu1 %792  ;;  %v4253_v34 = vpop.permute.xlu0 %680  ;;  %v3796_v35 = vpack.c.bf16 %v975_v30, %v975_v30  ;;  %v3795_v36 = vpack.c.bf16 %v974_v31, %v974_v31 }
  0x95   :  { %v698_v41 = vsel %vm692_vm2, %v679_v25, %v4253_v34 }
  0x96   :  { %196 = vrot.lane.b32.xlu1 %v4168_v7, %s4015_s28  ;;  %81 = vrot.lane.b32.xlu0 %v4168_v7, %s4013_s27  ;;  %v1247_v38 = vsel %vm1245_vm1, %v3795_v36, 0  ;;  %v747_v48 = vmul.f32 %v713_v37, %v698_v41  ;;  %v325_v41 = vld [vmem:[#allocation6 + $0x2] ss:$8 sm:$0xf0] }
  0x97   :  { %3583 = vmatprep.subr.msk.bf16.mxu0 %vm1245_vm1, %v3796_v35 }
  0x98   :  { %1277 = vmatpush1.bf16.msra.mxu0 %v1247_v38  ;;  %v4275_v43 = vpop.permute.xlu1 %676  ;;  %v4277_v44 = vpop.permute.xlu0 %794 }
  0x99   :  { %v812_v46 = vsel %vm806_vm3, %v793_v33, %v4277_v44  ;;  %v699_v52 = vsel %vm692_vm2, %v4275_v43, %v679_v25 }
  0x9a   :  { %v861_v49 = vmul.f32 %v827_v39, %v812_v46  ;;  %1058 = vperm.xlu0 %3913, %v1055_v42   ;;  %v746_v61 = vmul.f32 %v709_v45, %v699_v52  ;;  %v324_v39 = vld [vmem:[#allocation6 + $0x2] ss:$8 sm:$0xf]  ;;  %v717_v42 = vrot.slane %v4242_v28, %v4266_v40  ;;  %v721_v45 = vrot.slane %v4242_v28, %v4285_v47 }
  0x9b   :  { %v831_v46 = vrot.slane %v4250_v32, %v4266_v40 }
  0x9c   :  { %v911_v55 = vpop.permute.xlu1 %910  ;;  %v4294_v56 = vpop.permute.xlu0 %790  ;;  %v3788_v57 = vpack.c.bf16 %v861_v49, %v747_v48  ;;  %v835_v48 = vrot.slane %v4250_v32, %v4285_v47  ;;  %v438_v49 = vld [vmem:[#allocation6 + $0x3] ss:$8 sm:$0xf] }
  0x9d   :  { %v925_v58 = vsel %vm920_vm0, %v909_v17, %v911_v55  ;;  %v813_v59 = vsel %vm806_vm3, %v4294_v56, %v793_v33 }
  0x9e   :  { %v860_v62 = vmul.f32 %v823_v50, %v813_v59  ;;  %1278 = vmatprep.subr.bf16.mxu0 %v3788_v57  ;;  %v976_v9 = vmul.f32 %v945_v51, %v925_v58  ;;  %v439_v50 = vld [vmem:[#allocation6 + $0x3] ss:$8 sm:$0xf0] }
  0x9f   :  { %v4355_v57 = vor.u32 %v439_v50, %v438_v49  ;;  %v211_v49 = vld [vmem:[#allocation6 + $0x1] ss:$8 sm:$0xf0] }
  0xa0   :  { %v565_v11 = vpop.permute.xlu1 %564  ;;  %v4305_v12 = vpop.permute.xlu0 %912  ;;  %v3787_v19 = vpack.c.bf16 %v860_v62, %v746_v61  ;;  %v3797_v23 = vpack.c.bf16 %v976_v9, %v976_v9 }
  0xa1   :  { %v924_v17 = vsel %vm920_vm0, %v911_v55, %v4305_v12  ;;  %v4353_v55 = vor.u32 %v325_v41, %v324_v39  ;;  %v603_v41 = vrot.slane %v4303_v63, %v4266_v40 }
  0xa2   :  { %1279 = vmatpush1.bf16.msra.mxu0 %v3787_v19  ;;  %v977_v22 = vmul.f32 %v949_v60, %v924_v17  ;;  %v1253_v33 = vsel %vm1245_vm1, %v3797_v23, 0 }
  0xa3   :  { %v335_v19 = vrot.slane %v4353_v55, %v4221_v14 }
  0xa4   :  { %v4315_v24 = vpop.permute.xlu1 %562  ;;  %v4317_v25 = vpop.permute.xlu0 %566  ;;  %v3798_v26 = vpack.c.bf16 %v977_v22, %v977_v22 }
  0xa5   :  { %v585_v27 = vsel %vm578_vm4, %v4315_v24, %v565_v11  ;;  %v584_v29 = vsel %vm578_vm4, %v565_v11, %v4317_v25 }
  0xa6   :  { %v632_v30 = vmul.f32 %v595_v20, %v585_v27  ;;  %v633_v31 = vmul.f32 %v599_v21, %v584_v29  ;;  %3585 = vmatprep.subr.msk.bf16.mxu1 %vm1245_vm1, %v3798_v26  ;;  %v445_v27 = vrot.slane %v4355_v57, %v4226_v16  ;;  %v331_v29 = vrot.slane %v4353_v55, %v4226_v16 }
  0xa7   :  { %1318 = vmatpush1.bf16.msra.mxu1 %v1253_v33 }
  0xa8   :  { %v4327_v35 = vpop.permute.xlu1 %684  ;;  %v683_v36 = vpop.permute.xlu0 %682  ;;  %v3780_v37 = vpack.c.bf16 %v633_v31, %v4088_v2  ;;  %v3779_v38 = vpack.c.bf16 %v632_v30, %v4082_v1 }
  0xa9   :  { %v696_v1 = vsel %vm692_vm2, %v683_v36, %v4327_v35  ;;  %v697_v2 = vsel %vm692_vm2, %v4253_v34, %v683_v36 }
  0xaa   :  { %1280 = vmatprep.subr.bf16.mxu0 %v3780_v37  ;;  %v748_v58 = vmul.f32 %v717_v42, %v697_v2  ;;  %v749_v59 = vmul.f32 %v721_v45, %v696_v1  ;;  %v607_v42 = vrot.slane %v4303_v63, %v4285_v47  ;;  %v96_v45 = vld [vmem:[#allocation6] ss:$8 sm:$0xf] }
  0xab   :  { %1281 = vmatpush1.bf16.msra.mxu0 %v3779_v38 }
  0xac   :  { %v4345_v51 = vpop.permute.xlu1 %798  ;;  %v797_v52 = vpop.permute.xlu0 %796 }
  0xad   :  { %v810_v53 = vsel %vm806_vm3, %v797_v52, %v4345_v51  ;;  %v811_v54 = vsel %vm806_vm3, %v4277_v44, %v797_v52  ;;  %v449_v44 = vrot.slane %v4355_v57, %v4221_v14 }
  0xae   :  { %v862_v60 = vmul.f32 %v831_v46, %v811_v54  ;;  %v863_v34 = vmul.f32 %v835_v48, %v810_v53  ;;  %v97_v46 = vld [vmem:[#allocation6] ss:$8 sm:$0xf0]  ;;  %v210_v48 = vld [vmem:[#allocation6 + $0x1] ss:$8 sm:$0xf] }
  0xb0   :  { %v4357_v61 = vpop.permute.xlu1 %300  ;;  %v299_v62 = vpop.permute.xlu0 %298  ;;  %v3790_v9 = vpack.c.bf16 %v863_v34, %v749_v59  ;;  %v3789_v11 = vpack.c.bf16 %v862_v60, %v748_v58  ;;  %v4399_v59 = vor.u32 %v97_v46, %v96_v45  ;;  %v4401_v60 = vor.u32 %v211_v49, %v210_v48 }
  0xb1   :  { %v321_v17 = vsel %vm314_vm5, %v299_v62, %v4357_v61  ;;  %v339_v46 = vrot.slane %v4353_v55, %v4266_v40  ;;  %v4440_v48 = vsub.s32 4, %v4212_v10  ;;  %v4443_v49 = vsub.s32 5, %v4212_v10 }
  0xb2   :  { %1319 = vmatprep.subr.bf16.mxu1 %v3790_v9  ;;  %v369_v23 = vmul.f32 %v335_v19, %v321_v17  ;;  %v107_v19 = vrot.slane %v4399_v59, %v4221_v14 }
  0xb3   :  { %1320 = vmatpush1.bf16.msra.mxu1 %v3789_v11 }
  0xb4   :  { %v4368_v20 = vpop.permute.xlu1 %414  ;;  %v413_v21 = vpop.permute.xlu0 %412 }
  0xb5   :  { %v435_v22 = vsel %vm428_vm6, %v413_v21, %v4368_v20 }
  0xb6   :  { %v483_v26 = vmul.f32 %v449_v44, %v435_v22 }
  0xb8   :  { %v4377_v30 = vpop.permute.xlu1 %426  ;;  %v4379_v31 = vpop.permute.xlu0 %312  ;;  %v3772_v33 = vpack.c.bf16 %v483_v26, %v369_v23  ;;  %v217_v23 = vrot.slane %v4401_v60, %v4226_v16  ;;  %v103_v26 = vrot.slane %v4399_v59, %v4226_v16 }
  0xb9   :  { %v436_v36 = vsel %vm428_vm6, %v4377_v30, %v413_v21  ;;  %v322_v37 = vsel %vm314_vm5, %v4379_v31, %v299_v62 }
  0xba   :  { %v482_v38 = vmul.f32 %v445_v27, %v436_v36  ;;  %v368_v39 = vmul.f32 %v331_v29, %v322_v37  ;;  %1282 = vmatprep.subr.bf16.mxu0 %v3772_v33 }
  0xbc   :  { %v4391_v50 = vpop.permute.xlu1 %570  ;;  %v569_v1 = vpop.permute.xlu0 %568  ;;  %v3771_v2 = vpack.c.bf16 %v482_v38, %v368_v39 }
  0xbd   :  { %v582_v52 = vsel %vm578_vm4, %v569_v1, %v4391_v50  ;;  %v583_v53 = vsel %vm578_vm4, %v4317_v25, %v569_v1  ;;  %v221_v25 = vrot.slane %v4401_v60, %v4221_v14  ;;  %v343_v1 = vrot.slane %v4353_v55, %v4285_v47 }
  0xbe   :  { %v634_v54 = vmul.f32 %v603_v41, %v583_v53  ;;  %v635_v58 = vmul.f32 %v607_v42, %v582_v52  ;;  %1283 = vmatpush1.bf16.msra.mxu0 %v3771_v2  ;;  %v453_v2 = vrot.slane %v4355_v57, %v4266_v40  ;;  %v457_v52 = vrot.slane %v4355_v57, %v4285_v47  ;;  %v4454_v53 = vld [vmem:[%s5429_s2] sm:$0xf] }
  0xc0   :  { %v4403_v34 = vpop.permute.xlu1 %71  ;;  %v70_v62 = vpop.permute.xlu0 %69  ;;  %v3782_v9 = vpack.c.bf16 %v635_v58, %v4102_v3  ;;  %v3781_v11 = vpack.c.bf16 %v634_v54, %v4080_v0 }
  0xc1   :  { %v94_v44 = vsel %vm87_vm7, %v70_v62, %v4403_v34 }
  0xc2   :  { %1321 = vmatprep.subr.bf16.mxu1 %v3782_v9  ;;  %v141_v3 = vmul.f32 %v107_v19, %v94_v44 }
  0xc3   :  { %1322 = vmatpush1.bf16.msra.mxu1 %v3781_v11 }
  0xc4   :  { %v4416_v17 = vpop.permute.xlu1 %186  ;;  %v185_v21 = vpop.permute.xlu0 %184 }
  0xc5   :  { %v207_v0 = vsel %vm200_vm8, %v185_v21, %v4416_v17 }
  0xc6   :  { %v255_v22 = vmul.f32 %v221_v25, %v207_v0  ;;  %v953_v25 = vrot.slane %v4223_v15, %v4440_v48 }
  0xc8   :  { %v4425_v27 = vpop.permute.xlu1 %198  ;;  %v4427_v29 = vpop.permute.xlu0 %83  ;;  %v3764_v33 = vpack.c.bf16 %v255_v22, %v141_v3 }
  0xc9   :  { %v208_v36 = vsel %vm200_vm8, %v4425_v27, %v185_v21  ;;  %v95_v37 = vsel %vm87_vm7, %v4427_v29, %v70_v62 }
  0xca   :  { %v254_v38 = vmul.f32 %v217_v23, %v208_v36  ;;  %v140_v39 = vmul.f32 %v103_v26, %v95_v37  ;;  %1284 = vmatprep.subr.bf16.mxu0 %v3764_v33 }
  0xcc   :  { %v4435_v41 = vpop.permute.xlu1 %304  ;;  %v303_v42 = vpop.permute.xlu0 %302  ;;  %v3763_v45 = vpack.c.bf16 %v254_v38, %v140_v39 }
  0xcd   :  { %v319_v54 = vsel %vm314_vm5, %v303_v42, %v4435_v41  ;;  %v320_v58 = vsel %vm314_vm5, %v4357_v61, %v303_v42  ;;  %v957_v61 = vrot.slane %v4223_v15, %v4443_v49 }
  0xce   :  { %1285 = vmatpush1.bf16.msra.mxu0 %v3763_v45  ;;  %v370_v44 = vmul.f32 %v339_v46, %v320_v58  ;;  %v371_v21 = vmul.f32 %v343_v1, %v319_v54  ;;  %v111_v1 = vrot.slane %v4399_v59, %v4266_v40  ;;  %v229_v54 = vrot.slane %v4401_v60, %v4285_v47 }
  0xd0   :  { %v4462_v62 = vpop.permute.xlu1 %418  ;;  %v417_v9 = vpop.permute.xlu0 %416 }
  0xd1   :  { %v433_v11 = vsel %vm428_vm6, %v417_v9, %v4462_v62  ;;  %v434_v19 = vsel %vm428_vm6, %v4368_v20, %v417_v9  ;;  %3584 = vmatmul.mubr.msk.bf16.vlgmr.msra.gmra.mxu0 %vm1241_vm9, %v4454_v53 }
  0xd2   :  { %v484_v0 = vmul.f32 %v453_v2, %v434_v19  ;;  %v485_v3 = vmul.f32 %v457_v52, %v433_v11  ;;  %1384 = vmatprep.mubr.bf16.mxu0 %v5438_v6  ;;  %v115_v2 = vrot.slane %v4399_v59, %v4285_v47 }
  0xd4   :  { %v4477_v22 = vpop.permute.xlu1 %916  ;;  %v915_v23 = vpop.permute.xlu0 %914  ;;  %v3774_v26 = vpack.c.bf16 %v485_v3, %v371_v21  ;;  %v3773_v20 = vpack.c.bf16 %v484_v0, %v370_v44 }
  0xd5   :  { %v922_v33 = vsel %vm920_vm0, %v915_v23, %v4477_v22  ;;  %v923_v36 = vsel %vm920_vm0, %v4305_v12, %v915_v23  ;;  %v225_v12 = vrot.slane %v4401_v60, %v4266_v40 }
  0xd6   :  { %v978_v37 = vmul.f32 %v953_v25, %v923_v36  ;;  %v979_v38 = vmul.f32 %v957_v61, %v922_v33  ;;  %1323 = vmatprep.subr.bf16.mxu1 %v3774_v26 }
  0xd7   :  { %1324 = vmatpush1.bf16.msra.mxu1 %v3773_v20 }
  0xd8   :  { %v3799_v39 = vpack.c.bf16 %v978_v37, %v978_v37  ;;  %v3800_v42 = vpack.c.bf16 %v979_v38, %v979_v38  ;;  %v4485_v45 = vpop.permute.xlu1 %75  ;;  %v74_v46 = vpop.permute.xlu0 %73  ;;  %v4516_v37 = vsub.s32 6, %v4212_v10  ;;  %v839_v38 = vrot.slane %v4250_v32, %v4440_v48 }
  0xd9   :  { %v92_v58 = vsel %vm87_vm7, %v74_v46, %v4485_v45  ;;  %v93_v9 = vsel %vm87_vm7, %v4403_v34, %v74_v46  ;;  %v729_v34 = vrot.slane %v4242_v28, %v4443_v49 }
  0xda   :  { %3587 = vmatprep.subr.msk.bf16.mxu0 %vm1245_vm1, %v3800_v42  ;;  %v1259_v52 = vsel %vm1245_vm1, %v3799_v39, 0  ;;  %v142_v44 = vmul.f32 %v111_v1, %v93_v9  ;;  %v143_v21 = vmul.f32 %v115_v2, %v92_v58  ;;  %v843_v39 = vrot.slane %v4250_v32, %v4443_v49 }
  0xdb   :  { %1359 = vmatpush1.bf16.msra.mxu0 %v1259_v52  ;;  %v4525_v42 = vsub.s32 7, %v4212_v10  ;;  %v961_v58 = vrot.slane %v4223_v15, %v4516_v37 }
  0xdc   :  { %v4503_v11 = vpop.permute.xlu1 %190  ;;  %v189_v19 = vpop.permute.xlu0 %188 }
  0xdd   :  { %v205_v25 = vsel %vm200_vm8, %v189_v19, %v4503_v11  ;;  %v206_v61 = vsel %vm200_vm8, %v4416_v17, %v189_v19  ;;  %v725_v17 = vrot.slane %v4242_v28, %v4440_v48 }
  0xde   :  { %v256_v0 = vmul.f32 %v225_v12, %v206_v61  ;;  %v257_v3 = vmul.f32 %v229_v54, %v205_v25 }
  0xe0   :  { %v689_v23 = vpop.permute.xlu1 %688  ;;  %v687_v26 = vpop.permute.xlu0 %686  ;;  %v3766_v20 = vpack.c.bf16 %v257_v3, %v143_v21  ;;  %v3765_v33 = vpack.c.bf16 %v256_v0, %v142_v44 }
  0xe1   :  { %v694_v36 = vsel %vm692_vm2, %v687_v26, %v689_v23  ;;  %v695_v46 = vsel %vm692_vm2, %v4327_v35, %v687_v26  ;;  %v965_v35 = vrot.slane %v4223_v15, %v4525_v42 }
  0xe2   :  { %1325 = vmatprep.subr.bf16.mxu1 %v3766_v20  ;;  %v751_v1 = vmul.f32 %v729_v34, %v694_v36  ;;  %v750_v10 = vmul.f32 %v725_v17, %v695_v46  ;;  %v615_v20 = vrot.slane %v4303_v63, %v4443_v49 }
  0xe3   :  { %1326 = vmatpush1.bf16.msra.mxu1 %v3765_v33 }
  0xe4   :  { %v803_v2 = vpop.permute.xlu1 %802  ;;  %v801_v52 = vpop.permute.xlu0 %800 }
  0xe5   :  { %v808_v12 = vsel %vm806_vm3, %v801_v52, %v803_v2  ;;  %v809_v54 = vsel %vm806_vm3, %v4345_v51, %v801_v52  ;;  %v611_v51 = vrot.slane %v4303_v63, %v4440_v48 }
  0xe6   :  { %v864_v9 = vmul.f32 %v839_v38, %v809_v54  ;;  %v865_v19 = vmul.f32 %v843_v39, %v808_v12  ;;  %3586 = vmatmul.mubr.msk.bf16.vlgmr.msra.gmra.mxu1 %vm1241_vm9, %v4454_v53  ;;  %v847_v12 = vrot.slane %v4250_v32, %v4516_v37  ;;  %v851_v54 = vrot.slane %v4250_v32, %v4525_v42 }
  0xe7   :  { %1425 = vmatprep.mubr.bf16.mxu1 %v5438_v6 }
  0xe8   :  { %v3791_v25 = vpack.c.bf16 %v864_v9, %v750_v10  ;;  %v573_v61 = vpop.permute.xlu1 %572  ;;  %v919_v44 = vpop.permute.xlu0 %918  ;;  %v3792_v21 = vpack.c.bf16 %v865_v19, %v751_v1 }
  0xe9   :  { %v921_v0 = vsel %vm920_vm0, %v4477_v22, %v919_v44  ;;  %v928_v3 = vsel %vm920_vm0, %v919_v44, %v4228_v18  ;;  %v581_v15 = vsel %vm578_vm4, %v4391_v50, %v573_v61  ;;  %v733_v22 = vrot.slane %v4242_v28, %v4516_v37 }
  0xea   :  { %v980_v34 = vmul.f32 %v961_v58, %v921_v0  ;;  %v981_v26 = vmul.f32 %v965_v35, %v928_v3  ;;  %1360 = vmatprep.subr.bf16.mxu0 %v3792_v21  ;;  %v636_v39 = vmul.f32 %v611_v51, %v581_v15  ;;  %v737_v18 = vrot.slane %v4242_v28, %v4525_v42 }
  0xeb   :  { %1361 = vmatpush1.bf16.msra.mxu0 %v3791_v25  ;;  %v351_v51 = vrot.slane %v4353_v55, %v4443_v49  ;;  %v619_v3 = vrot.slane %v4303_v63, %v4516_v37  ;;  %v623_v15 = vrot.slane %v4303_v63, %v4525_v42 }
  0xec   :  { %v3801_v33 = vpack.c.bf16 %v980_v34, %v980_v34  ;;  %v3802_v36 = vpack.c.bf16 %v981_v26, %v981_v26  ;;  %v691_v17 = vpop.permute.xlu1 %690  ;;  %v575_v38 = vpop.permute.xlu0 %574  ;;  %v3783_v19 = vpack.c.bf16 %v636_v39, %v4108_v4  ;;  %v465_v34 = vrot.slane %v4355_v57, %v4443_v49 }
  0xed   :  { %v693_v50 = vsel %vm692_vm2, %v689_v23, %v691_v17  ;;  %v580_v46 = vsel %vm578_vm4, %v573_v61, %v575_v38  ;;  %v700_v28 = vsel %vm692_vm2, %v691_v17, %v4275_v43  ;;  %v347_v26 = vrot.slane %v4353_v55, %v4440_v48 }
  0xee   :  { %v637_v1 = vmul.f32 %v615_v20, %v580_v46  ;;  %3589 = vmatprep.subr.msk.bf16.mxu1 %vm1245_vm1, %v3802_v36  ;;  %v1265_v52 = vsel %vm1245_vm1, %v3801_v33, 0  ;;  %v752_v23 = vmul.f32 %v733_v22, %v693_v50  ;;  %v753_v32 = vmul.f32 %v737_v18, %v700_v28 }
  0xef   :  { %1400 = vmatpush1.bf16.msra.mxu1 %v1265_v52 }
  0xf0   :  { %v307_v58 = vpop.permute.xlu1 %306  ;;  %v805_v10 = vpop.permute.xlu0 %804  ;;  %v3784_v9 = vpack.c.bf16 %v637_v1, %v4170_v8 }
  0xf1   :  { %v807_v35 = vsel %vm806_vm3, %v803_v2, %v805_v10  ;;  %v814_v25 = vsel %vm806_vm3, %v805_v10, %v4294_v56  ;;  %v461_v2 = vrot.slane %v4355_v57, %v4440_v48  ;;  %v318_v20 = vsel %vm314_vm5, %v4435_v41, %v307_v58 }
  0xf2   :  { %v866_v61 = vmul.f32 %v847_v12, %v807_v35  ;;  %v867_v44 = vmul.f32 %v851_v54, %v814_v25  ;;  %1362 = vmatprep.subr.bf16.mxu0 %v3784_v9  ;;  %v372_v1 = vmul.f32 %v347_v26, %v318_v20  ;;  %v123_v12 = vrot.slane %v4399_v59, %v4443_v49 }
  0xf3   :  { %1363 = vmatpush1.bf16.msra.mxu0 %v3783_v19  ;;  %v237_v10 = vrot.slane %v4401_v60, %v4443_v49  ;;  %v469_v25 = vrot.slane %v4355_v57, %v4516_v37 }
  0xf4   :  { %v3793_v43 = vpack.c.bf16 %v866_v61, %v752_v23  ;;  %v421_v21 = vpop.permute.xlu1 %420  ;;  %v4581_v8 = vpop.permute.xlu0 %308  ;;  %v3794_v4 = vpack.c.bf16 %v867_v44, %v753_v32  ;;  %v473_v44 = vrot.slane %v4355_v57, %v4525_v42  ;;  %v127_v57 = vrot.slane %v4399_v59, %v4516_v37 }
  0xf5   :  { %v317_v56 = vsel %vm314_vm5, %v307_v58, %v4581_v8  ;;  %v432_v0 = vsel %vm428_vm6, %v4462_v62, %v421_v21  ;;  %v119_v58 = vrot.slane %v4399_v59, %v4440_v48 }
  0xf6   :  { %1401 = vmatprep.subr.bf16.mxu1 %v3794_v4  ;;  %v373_v33 = vmul.f32 %v351_v51, %v317_v56  ;;  %v486_v22 = vmul.f32 %v461_v2, %v432_v0  ;;  %v355_v4 = vrot.slane %v4353_v55, %v4516_v37  ;;  %v241_v2 = vrot.slane %v4401_v60, %v4516_v37 }
  0xf7   :  { %1402 = vmatpush1.bf16.msra.mxu1 %v3793_v43  ;;  %v245_v56 = vrot.slane %v4401_v60, %v4525_v42 }
  0xf8   :  { %v577_v62 = vpop.permute.xlu1 %576  ;;  %v423_v36 = vpop.permute.xlu0 %422  ;;  %v3775_v23 = vpack.c.bf16 %v486_v22, %v372_v1 }
  0xf9   :  { %v579_v17 = vsel %vm578_vm4, %v575_v38, %v577_v62  ;;  %v586_v63 = vsel %vm578_vm4, %v577_v62, %v4315_v24  ;;  %v431_v39 = vsel %vm428_vm6, %v421_v21, %v423_v36 }
  0xfa   :  { %v638_v18 = vmul.f32 %v619_v3, %v579_v17  ;;  %v639_v50 = vmul.f32 %v623_v15, %v586_v63  ;;  %v487_v46 = vmul.f32 %v465_v34, %v431_v39  ;;  %v131_v34 = vrot.slane %v4399_v59, %v4525_v42 }
  0xfc   :  { %v3785_v41 = vpack.c.bf16 %v638_v18, %v4168_v7  ;;  %v80_v52 = vpop.permute.xlu1 %79  ;;  %v78_v54 = vpop.permute.xlu0 %77  ;;  %v3776_v28 = vpack.c.bf16 %v487_v46, %v373_v33  ;;  %v3786_v38 = vpack.c.bf16 %v639_v50, %v4134_v5  ;;  %v233_v7 = vrot.slane %v4401_v60, %v4440_v48 }
  0xfd   :  { %v90_v24 = vsel %vm87_vm7, %v78_v54, %v80_v52  ;;  %v91_v9 = vsel %vm87_vm7, %v4485_v45, %v78_v54  ;;  %v359_v45 = vrot.slane %v4353_v55, %v4525_v42 }
  0xfe   :  { %1364 = vmatprep.subr.bf16.mxu0 %v3776_v28  ;;  %1403 = vmatprep.subr.bf16.mxu1 %v3786_v38  ;;  %v145_v5 = vmul.f32 %v123_v12, %v90_v24  ;;  %v144_v43 = vmul.f32 %v119_v58, %v91_v9 }
  0xff   :  { %1365 = vmatpush1.bf16.msra.mxu0 %v3775_v23  ;;  %1404 = vmatpush1.bf16.msra.mxu1 %v3785_v41 }
 0x100   :  { %v195_v19 = vpop.permute.xlu1 %194  ;;  %v193_v35 = vpop.permute.xlu0 %192 }
 0x101   :  { %v203_v32 = vsel %vm200_vm8, %v193_v35, %v195_v19  ;;  %v204_v61 = vsel %vm200_vm8, %v4503_v11, %v193_v35 }
 0x102   :  { %v258_v21 = vmul.f32 %v233_v7, %v204_v61  ;;  %v259_v51 = vmul.f32 %v237_v10, %v203_v32 }
 0x104   :  { %v3767_v0 = vpack.c.bf16 %v258_v21, %v144_v43  ;;  %v425_v11 = vpop.permute.xlu1 %424  ;;  %v311_v3 = vpop.permute.xlu0 %310  ;;  %v3768_v15 = vpack.c.bf16 %v259_v51, %v145_v5 }
 0x105   :  { %v429_v55 = vsel %vm428_vm6, %v425_v11, %v4377_v30  ;;  %v430_v26 = vsel %vm428_vm6, %v423_v36, %v425_v11  ;;  %v315_v60 = vsel %vm314_vm5, %v311_v3, %v4379_v31  ;;  %v316_v20 = vsel %vm314_vm5, %v4581_v8, %v311_v3 }
 0x106   :  { %v488_v33 = vmul.f32 %v469_v25, %v430_v26  ;;  %v489_v62 = vmul.f32 %v473_v44, %v429_v55  ;;  %v374_v22 = vmul.f32 %v355_v4, %v316_v20  ;;  %v375_v17 = vmul.f32 %v359_v45, %v315_v60  ;;  %1366 = vmatprep.subr.bf16.mxu0 %v3768_v15 }
 0x107   :  { %1367 = vmatpush1.bf16.msra.mxu0 %v3767_v0 }
 0x108   :  { %v3777_v59 = vpack.c.bf16 %v488_v33, %v374_v22  ;;  %v197_v63 = vpop.permute.xlu1 %196  ;;  %v82_v30 = vpop.permute.xlu0 %81  ;;  %v3778_v39 = vpack.c.bf16 %v489_v62, %v375_v17  ;;  %v2286_v33 = vld [vmem:[#allocation6 + $0x7] ss:$8 sm:$0xf] }
 0x109   :  { %v201_v36 = vsel %vm200_vm8, %v197_v63, %v4425_v27  ;;  %v202_v31 = vsel %vm200_vm8, %v195_v19, %v197_v63  ;;  %v88_v8 = vsel %vm87_vm7, %v82_v30, %v4427_v29  ;;  %v89_v18 = vsel %vm87_vm7, %v80_v52, %v82_v30  ;;  %v2287_v62 = vld [vmem:[#allocation6 + $0x7] ss:$8 sm:$0xf0] }
 0x10a   :  { %v260_v50 = vmul.f32 %v241_v2, %v202_v31  ;;  %v261_v46 = vmul.f32 %v245_v56, %v201_v36  ;;  %v146_v1 = vmul.f32 %v127_v57, %v89_v18  ;;  %v147_v41 = vmul.f32 %v131_v34, %v88_v8  ;;  %3588 = vmatmul.mubr.msk.bf16.vlgmr.msra.gmra.mxu0 %vm1241_vm9, %v4454_v53  ;;  %v2174_v8 = vld [vmem:[#allocation6 + $0x6] ss:$8 sm:$0xf] }
 0x10b   :  { %1405 = vmatprep.subr.bf16.mxu1 %v3778_v39  ;;  %2656 = vmatprep.mubr.bf16.mxu0 %v5438_v6  ;;  %v4822_v22 = vor.u32 %v2287_v62, %v2286_v33  ;;  %v2175_v18 = vld [vmem:[#allocation6 + $0x6] ss:$8 sm:$0xf0] }
 0x10c   :  { %v3769_v27 = vpack.c.bf16 %v260_v50, %v146_v1  ;;  %1406 = vmatpush1.bf16.msra.mxu1 %v3777_v59  ;;  %v3770_v12 = vpack.c.bf16 %v261_v46, %v147_v41  ;;  %v2062_v46 = vld [vmem:[#allocation6 + $0x5] ss:$8 sm:$0xf] }
 0x10d   :  { %v2293_v59 = vrot.slane %v4822_v22, %v4226_v16  ;;  %v2297_v36 = vrot.slane %v4822_v22, %v4221_v14  ;;  %v2063_v1 = vld [vmem:[#allocation6 + $0x5] ss:$8 sm:$0xf0] }
 0x10e   :  { %1407 = vmatprep.subr.bf16.mxu1 %v3770_v12 }
 0x110   :  { %1408 = vmatpush1.bf16.msra.mxu1 %v3769_v27 }
 0x113   :  { %3590 = vmatmul.mubr.msk.bf16.vlgmr.msra.gmra.mxu1 %vm1241_vm9, %v4454_v53 }
 0x114   :  { %2697 = vmatprep.mubr.bf16.mxu1 %v5438_v6  ;;  %v1579_v6 = vld [vmem:[#allocation6 + $0x1] ss:$8 sm:$0xf0] }
 0x115   :  { %v4672_v29 = vpop.permute.xlu0 %1058 }
 0x191   :  { %v1304_v52 = vpop.f32.mrf.mxu0 }
 0x192   :  { %v1305_v54 = vadd.f32 %v1304_v52, %v4672_v29 }
 0x193   :  { %v1306_v28 = vpop.f32.mrf.mxu0 }
 0x194   :  { %v4675_v38 = vmax.f32 %v1305_v54, 0.0  ;;  %v1307_v58 = vadd.f32 %v1306_v28, %v4672_v29  ;;  %v4848_v54 = vor.u32 %v2063_v1, %v2062_v46 }
 0x195   :  { %v1308_v23 = vpop.f32.mrf.mxu0 }
 0x196   :  { %2262 = vrot.lane.b32.xlu1 %v4675_v38, %s4007_s0  ;;  %v4682_v53 = vmax.f32 %v1307_v58, 0.0  ;;  %v2073_v58 = vrot.slane %v4848_v54, %v4221_v14 }
 0x197   :  { %v1309_v24 = vpop.f32.mrf.mxu0 }
 0x198   :  { %v1950_v24 = vld [vmem:[#allocation6 + $0x4] ss:$8 sm:$0xf] }
 0x19a   :  { %2038 = vrot.lane.b32.xlu1 %v4675_v38, %s4008_s23 }
 0x19e   :  { %1926 = vrot.lane.b32.xlu1 %v4675_v38, %s4010_s24 }
 0x1a2   :  { %2264 = vrot.lane.b32.xlu1 %v4682_v53, %s4007_s0 }
 0x1a6   :  { %v1345_v7 = vpop.f32.mrf.mxu1  ;;  %2040 = vrot.lane.b32.xlu1 %v4682_v53, %s4008_s23 }
 0x1a7   :  { %v1346_v10 = vadd.f32 %v1345_v7, %v4672_v29 }
 0x1a8   :  { %v1347_v9 = vpop.f32.mrf.mxu1 }
 0x1a9   :  { %v4691_v5 = vmax.f32 %v1346_v10, 0.0  ;;  %v1348_v19 = vadd.f32 %v1347_v9, %v4672_v29  ;;  %v1951_v10 = vld [vmem:[#allocation6 + $0x4] ss:$8 sm:$0xf0] }
 0x1aa   :  { %v1349_v35 = vpop.f32.mrf.mxu1  ;;  %2152 = vrot.lane.b32.xlu1 %v4682_v53, %s4009_s1 }
 0x1ab   :  { %v4696_v25 = vmax.f32 %v1348_v19, 0.0  ;;  %2266 = vrot.lane.b32.xlu0 %v4691_v5, %s4007_s0 }
 0x1ac   :  { %v1350_v32 = vpop.f32.mrf.mxu1 }
 0x1ad   :  { %v2411_v32 = vld [vmem:[%s5432_s5] sm:$0xff] }
 0x1ae   :  { %2268 = vrot.lane.b32.xlu1 %v4696_v25, %s4007_s0 }
 0x1af   :  { %2042 = vrot.lane.b32.xlu0 %v4691_v5, %s4008_s23 }
 0x1b2   :  { %1928 = vrot.lane.b32.xlu1 %v4682_v53, %s4010_s24 }
 0x1b3   :  { %2154 = vrot.lane.b32.xlu0 %v4691_v5, %s4009_s1 }
 0x1b6   :  { %2044 = vrot.lane.b32.xlu1 %v4696_v25, %s4008_s23 }
 0x1b7   :  { %2150 = vrot.lane.b32.xlu0 %v4675_v38, %s4009_s1 }
 0x1ba   :  { %2156 = vrot.lane.b32.xlu1 %v4696_v25, %s4009_s1 }
 0x1bb   :  { %1930 = vrot.lane.b32.xlu0 %v4691_v5, %s4010_s24 }
 0x1be   :  { %1668 = vrot.lane.b32.xlu1 %v4682_v53, %s4011_s25 }
 0x1bf   :  { %1666 = vrot.lane.b32.xlu0 %v4675_v38, %s4011_s25 }
 0x1c2   :  { %1780 = vrot.lane.b32.xlu1 %v4682_v53, %s4012_s26 }
 0x1c3   :  { %1778 = vrot.lane.b32.xlu0 %v4675_v38, %s4012_s26 }
 0x1c6   :  { %1444 = vrot.lane.b32.xlu1 %v4682_v53, %s4013_s27 }
 0x1c7   :  { %1442 = vrot.lane.b32.xlu0 %v4675_v38, %s4013_s27 }
 0x1ca   :  { %v1386_v61 = vpop.f32.mrf.mxu0  ;;  %1556 = vrot.lane.b32.xlu1 %v4682_v53, %s4015_s28 }
 0x1cb   :  { %1554 = vrot.lane.b32.xlu0 %v4675_v38, %s4015_s28  ;;  %v1387_v2 = vadd.f32 %v1386_v61, %v4672_v29 }
 0x1cc   :  { %v1388_v44 = vpop.f32.mrf.mxu0 }
 0x1cd   :  { %v4749_v0 = vmax.f32 %v1387_v2, 0.0  ;;  %v1389_v34 = vadd.f32 %v1388_v44, %v4672_v29  ;;  %v4868_v44 = vor.u32 %v1951_v10, %v1950_v24 }
 0x1ce   :  { %1672 = vrot.lane.b32.xlu1 %v4696_v25, %s4011_s25  ;;  %v1390_v45 = vpop.f32.mrf.mxu0 }
 0x1cf   :  { %1670 = vrot.lane.b32.xlu0 %v4691_v5, %s4011_s25  ;;  %5449 = vst [vmem:[#allocation12_spill] sm:$0xff] %v4749_v0  ;;  %v4790_v55 = vmax.f32 %v1389_v34, 0.0  ;;  %v1957_v34 = vrot.slane %v4868_v44, %v4226_v16 }
 0x1d0   :  { %v1391_v43 = vpop.f32.mrf.mxu0 }
 0x1d1   :  { %5452 = vst [vmem:[#allocation15_spill] sm:$0xff] %v4790_v55  ;;  %v2069_v43 = vrot.slane %v4848_v54, %v4226_v16 }
 0x1d2   :  { %1784 = vrot.lane.b32.xlu1 %v4696_v25, %s4012_s26 }
 0x1d3   :  { %v1427_v21 = vpop.f32.mrf.mxu1  ;;  %1782 = vrot.lane.b32.xlu0 %v4691_v5, %s4012_s26 }
 0x1d4   :  { %v1428_v11 = vadd.f32 %v1427_v21, %v4672_v29 }
 0x1d5   :  { %v1429_v51 = vpop.f32.mrf.mxu1 }
 0x1d6   :  { %1448 = vrot.lane.b32.xlu1 %v4696_v25, %s4013_s27  ;;  %v4756_v3 = vmax.f32 %v1428_v11, 0.0  ;;  %v1430_v15 = vadd.f32 %v1429_v51, %v4672_v29  ;;  %v4844_v29 = vor.u32 %v2175_v18, %v2174_v8  ;;  %v1802_v8 = vld [vmem:[#allocation6 + $0x3] ss:$8 sm:$0xf] }
 0x1d7   :  { %1446 = vrot.lane.b32.xlu0 %v4691_v5, %s4013_s27  ;;  %v1431_v4 = vpop.f32.mrf.mxu1  ;;  %v1803_v18 = vld [vmem:[#allocation6 + $0x3] ss:$8 sm:$0xf0] }
 0x1d8   :  { %5450 = vst [vmem:[#allocation13_spill] sm:$0xff] %v4756_v3  ;;  %v4779_v57 = vmax.f32 %v1430_v15, 0.0  ;;  %v2185_v9 = vrot.slane %v4844_v29, %v4221_v14  ;;  %v2181_v4 = vrot.slane %v4844_v29, %v4226_v16 }
 0x1d9   :  { %v1432_v56 = vpop.f32.mrf.mxu1 }
 0x1da   :  { %1560 = vrot.lane.b32.xlu1 %v4696_v25, %s4015_s28  ;;  %5451 = vst [vmem:[#allocation14_spill] sm:$0xff] %v4779_v57 }
 0x1db   :  { %1558 = vrot.lane.b32.xlu0 %v4691_v5, %s4015_s28 }
 0x1de   :  { %1934 = vrot.lane.b32.xlu1 %v4749_v0, %s4010_s24 }
 0x1df   :  { %1932 = vrot.lane.b32.xlu0 %v4696_v25, %s4010_s24 }
 0x1e2   :  { %2274 = vrot.lane.b32.xlu1 %v4756_v3, %s4007_s0 }
 0x1e3   :  { %2270 = vrot.lane.b32.xlu0 %v4749_v0, %s4007_s0 }
 0x1e6   :  { %2050 = vrot.lane.b32.xlu1 %v4756_v3, %s4008_s23 }
 0x1e7   :  { %2046 = vrot.lane.b32.xlu0 %v4749_v0, %s4008_s23 }
 0x1ea   :  { %2162 = vrot.lane.b32.xlu1 %v4756_v3, %s4009_s1 }
 0x1eb   :  { %2158 = vrot.lane.b32.xlu0 %v4749_v0, %s4009_s1 }
 0x1ee   :  { %1674 = vrot.lane.b32.xlu1 %v4749_v0, %s4011_s25 }
 0x1ef   :  { %1938 = vrot.lane.b32.xlu0 %v4756_v3, %s4010_s24 }
 0x1f2   :  { %1786 = vrot.lane.b32.xlu1 %v4749_v0, %s4012_s26 }
 0x1f3   :  { %1450 = vrot.lane.b32.xlu0 %v4749_v0, %s4013_s27 }
 0x1f6   :  { %1792 = vrot.lane.b32.xlu1 %v4779_v57, %s4012_s26 }
 0x1f7   :  { %1562 = vrot.lane.b32.xlu0 %v4749_v0, %s4015_s28 }
 0x1fa   :  { %1568 = vrot.lane.b32.xlu1 %v4779_v57, %s4015_s28 }
 0x1fb   :  { %1680 = vrot.lane.b32.xlu0 %v4779_v57, %s4011_s25 }
 0x1fe   :  { %1936 = vrot.lane.b32.xlu1 %v4790_v55, %s4010_s24 }
 0x1ff   :  { %1456 = vrot.lane.b32.xlu0 %v4779_v57, %s4013_s27 }
 0x202   :  { %2052 = vrot.lane.b32.xlu1 %v4779_v57, %s4008_s23 }
 0x203   :  { %2272 = vrot.lane.b32.xlu0 %v4790_v55, %s4007_s0 }
 0x206   :  { %1790 = vrot.lane.b32.xlu1 %v4756_v3, %s4012_s26 }
 0x207   :  { %2048 = vrot.lane.b32.xlu0 %v4790_v55, %s4008_s23 }
 0x208   :  { %v4804_v26 = vpop.permute.xlu1 %2262 }
 0x209   :  { %5453 = vst [vmem:[#allocation16_spill] sm:$0xff] %v4804_v26 }
 0x20a   :  { %1940 = vrot.lane.b32.xlu1 %v4779_v57, %s4010_s24 }
 0x20b   :  { %2160 = vrot.lane.b32.xlu0 %v4790_v55, %s4009_s1 }
 0x20c   :  { %v4810_v60 = vpop.permute.xlu1 %2038 }
 0x20d   :  { %5454 = vst [vmem:[#allocation17_spill] sm:$0xff] %v4810_v60 }
 0x20e   :  { %1452 = vrot.lane.b32.xlu1 %v4790_v55, %s4013_s27 }
 0x20f   :  { %2276 = vrot.lane.b32.xlu0 %v4779_v57, %s4007_s0 }
 0x210   :  { %v4816_v20 = vpop.permute.xlu1 %1926 }
 0x211   :  { %5455 = vst [vmem:[#allocation18_spill] sm:$0xff] %v4816_v20 }
 0x212   :  { %1564 = vrot.lane.b32.xlu1 %v4790_v55, %s4015_s28 }
 0x213   :  { %2164 = vrot.lane.b32.xlu0 %v4779_v57, %s4009_s1 }
 0x214   :  { %v2265_v17 = vpop.permute.xlu1 %2264 }
 0x215   :  { %v2284_v63 = vsel %vm920_vm0, %v4804_v26, %v2265_v17 }
 0x216   :  { %1566 = vrot.lane.b32.xlu1 %v4756_v3, %s4015_s28  ;;  %v2330_v39 = vmul.f32 %v2293_v59, %v2284_v63  ;;  %v1961_v63 = vrot.slane %v4868_v44, %v4221_v14 }
 0x217   :  { %1676 = vrot.lane.b32.xlu0 %v4790_v55, %s4011_s25 }
 0x218   :  { %v2041_v30 = vpop.permute.xlu1 %2040  ;;  %v3835_v27 = vpack.c.bf16 %v2330_v39, %v2330_v39  ;;  %v1691_v39 = vld [vmem:[#allocation6 + $0x2] ss:$8 sm:$0xf0] }
 0x219   :  { %v2060_v2 = vsel %vm692_vm2, %v4810_v60, %v2041_v30 }
 0x21a   :  { %v2601_v7 = vsel %vm1245_vm1, %v3835_v27, 0  ;;  %v2106_v62 = vmul.f32 %v2069_v43, %v2060_v2 }
 0x21b   :  { %1788 = vrot.lane.b32.xlu0 %v4790_v55, %s4012_s26 }
 0x21c   :  { %v2153_v31 = vpop.permute.xlu1 %2152 }
 0x21d   :  { %v4837_v50 = vpop.permute.xlu0 %2266 }
 0x21e   :  { %v2283_v41 = vsel %vm920_vm0, %v2265_v17, %v4837_v50 }
 0x21f   :  { %v2331_v12 = vmul.f32 %v2297_v36, %v2283_v41  ;;  %1678 = vrot.lane.b32.xlu0 %v4756_v3, %s4011_s25 }
 0x220   :  { %v4846_v52 = vpop.permute.xlu1 %2268 }
 0x221   :  { %v3836_v28 = vpack.c.bf16 %v2331_v12, %v2331_v12  ;;  %v4850_v23 = vpop.permute.xlu0 %2042 }
 0x222   :  { %v2059_v19 = vsel %vm692_vm2, %v2041_v30, %v4850_v23  ;;  %v1690_v30 = vld [vmem:[#allocation6 + $0x2] ss:$8 sm:$0xf] }
 0x223   :  { %1454 = vrot.lane.b32.xlu0 %v4756_v3, %s4013_s27  ;;  %3667 = vmatprep.subr.msk.bf16.mxu0 %vm1245_vm1, %v3836_v28  ;;  %v2107_v21 = vmul.f32 %v2073_v58, %v2059_v19  ;;  %v4901_v12 = vor.u32 %v1691_v39, %v1690_v30  ;;  %v4903_v28 = vor.u32 %v1803_v18, %v1802_v8 }
 0x224   :  { %2631 = vmatpush1.bf16.msra.mxu0 %v2601_v7  ;;  %v1929_v35 = vpop.permute.xlu1 %1928  ;;  %v2301_v8 = vrot.slane %v4822_v22, %v4266_v40  ;;  %v2282_v18 = vsel %vm920_vm0, %v4837_v50, %v4846_v52  ;;  %v1466_v50 = vld [vmem:[#allocation6] ss:$8 sm:$0xf]  ;;  %v1969_v3 = vrot.slane %v4868_v44, %v4285_v47 }
 0x225   :  { %v4866_v61 = vpop.permute.xlu0 %2154  ;;  %v1948_v17 = vsel %vm578_vm4, %v4816_v20, %v1929_v35  ;;  %v1813_v19 = vrot.slane %v4903_v28, %v4221_v14  ;;  %v1821_v60 = vrot.slane %v4903_v28, %v4285_v47 }
 0x226   :  { %v2171_v45 = vsel %vm806_vm3, %v2153_v31, %v4866_v61 }
 0x227   :  { %v2219_v51 = vmul.f32 %v2185_v9, %v2171_v45  ;;  %2414 = vperm.xlu0 %3913, %v2411_v32   ;;  %v1701_v9 = vrot.slane %v4901_v12, %v4221_v14 }
 0x228   :  { %v4880_v56 = vpop.permute.xlu1 %2044 }
 0x229   :  { %v4882_v11 = vpop.permute.xlu0 %2150  ;;  %v3828_v15 = vpack.c.bf16 %v2219_v51, %v2107_v21 }
 0x22a   :  { %5456 = vst [vmem:[#allocation19_spill] sm:$0xff] %v4882_v11  ;;  %v2172_v33 = vsel %vm806_vm3, %v4882_v11, %v2153_v31  ;;  %v1994_v31 = vmul.f32 %v1957_v34, %v1948_v17 }
 0x22b   :  { %v2218_v59 = vmul.f32 %v2181_v4, %v2172_v33  ;;  %2632 = vmatprep.subr.bf16.mxu0 %v3828_v15 }
 0x22c   :  { %v4894_v36 = vpop.permute.xlu1 %2156  ;;  %v3819_v10 = vpack.c.bf16 %v1994_v31, %v4675_v38 }
 0x22d   :  { %v3827_v46 = vpack.c.bf16 %v2218_v59, %v2106_v62  ;;  %v4896_v1 = vpop.permute.xlu0 %1930 }
 0x22e   :  { %v1947_v41 = vsel %vm578_vm4, %v1929_v35, %v4896_v1 }
 0x22f   :  { %v1995_v27 = vmul.f32 %v1961_v63, %v1947_v41  ;;  %2633 = vmatpush1.bf16.msra.mxu0 %v3827_v46  ;;  %v2332_v41 = vmul.f32 %v2301_v8, %v2282_v18  ;;  %v2189_v8 = vrot.slane %v4844_v29, %v4266_v40  ;;  %v1578_v18 = vld [vmem:[#allocation6 + $0x1] ss:$8 sm:$0xf] }
 0x230   :  { %v4905_v24 = vpop.permute.xlu1 %1668  ;;  %v5002_v0 = vor.u32 %v1579_v6, %v1578_v18  ;;  %v1709_v18 = vrot.slane %v4901_v12, %v4285_v47 }
 0x231   :  { %v4907_v58 = vpop.permute.xlu0 %1666  ;;  %v3820_v7 = vpack.c.bf16 %v1995_v27, %v4682_v53  ;;  %v2305_v27 = vrot.slane %v4822_v22, %v4285_v47 }
 0x232   :  { %v1688_v35 = vsel %vm314_vm5, %v4907_v58, %v4905_v24 }
 0x233   :  { %2634 = vmatprep.subr.bf16.mxu0 %v3820_v7  ;;  %v1735_v53 = vmul.f32 %v1701_v9, %v1688_v35 }
 0x234   :  { %2635 = vmatpush1.bf16.msra.mxu0 %v3819_v10  ;;  %v4919_v32 = vpop.permute.xlu1 %1780 }
 0x235   :  { %v4921_v45 = vpop.permute.xlu0 %1778 }
 0x236   :  { %v1800_v38 = vsel %vm428_vm6, %v4921_v45, %v4919_v32 }
 0x237   :  { %v1847_v43 = vmul.f32 %v1813_v19, %v1800_v38  ;;  %v3837_v19 = vpack.c.bf16 %v2332_v41, %v2332_v41  ;;  %v2081_v41 = vrot.slane %v4848_v54, %v4285_v47 }
 0x238   :  { %v4927_v21 = vpop.permute.xlu1 %1444 }
 0x239   :  { %v4929_v51 = vpop.permute.xlu0 %1442  ;;  %v3812_v4 = vpack.c.bf16 %v1847_v43, %v1735_v53  ;;  %v1467_v53 = vld [vmem:[#allocation6] ss:$8 sm:$0xf0] }
 0x23b   :  { %2636 = vmatprep.subr.bf16.mxu0 %v3812_v4 }
 0x23c   :  { %v4931_v2 = vpop.permute.xlu1 %1556 }
 0x23d   :  { %v4933_v15 = vpop.permute.xlu0 %1554 }
 0x240   :  { %v4935_v34 = vpop.permute.xlu1 %1672 }
 0x241   :  { %v4937_v33 = vpop.permute.xlu0 %1670 }
 0x244   :  { %v4939_v62 = vpop.permute.xlu1 %1784 }
 0x245   :  { %v1783_v17 = vpop.permute.xlu0 %1782 }
 0x248   :  { %v4941_v59 = vpop.permute.xlu1 %1448 }
 0x249   :  { %v4943_v63 = vpop.permute.xlu0 %1446 }
 0x24c   :  { %v4945_v30 = vpop.permute.xlu1 %1560 }
 0x24d   :  { %v4947_v39 = vpop.permute.xlu0 %1558 }
 0x250   :  { %v4955_v46 = vpop.permute.xlu1 %1934 }
 0x251   :  { %v1933_v31 = vpop.permute.xlu0 %1932 }
 0x252   :  { %v1945_v57 = vsel %vm578_vm4, %v1933_v31, %v4955_v46 }
 0x253   :  { %v1997_v6 = vmul.f32 %v1969_v3, %v1945_v57  ;;  %v1713_v3 = vrot.slane %v4901_v12, %v4440_v48 }
 0x254   :  { %v4959_v7 = vpop.permute.xlu1 %2274 }
 0x255   :  { %v4961_v10 = vpop.permute.xlu0 %2270 }
 0x256   :  { %v2281_v9 = vsel %vm920_vm0, %v4846_v52, %v4961_v10  ;;  %v2170_v52 = vsel %vm806_vm3, %v4866_v61, %v4894_v36 }
 0x257   :  { %v2333_v35 = vmul.f32 %v2305_v27, %v2281_v9  ;;  %v2607_v27 = vsel %vm1245_vm1, %v3837_v19, 0  ;;  %v2193_v9 = vrot.slane %v4844_v29, %v4285_v47  ;;  %v2058_v19 = vsel %vm692_vm2, %v4850_v23, %v4880_v56 }
 0x258   :  { %v4967_v38 = vpop.permute.xlu1 %2050  ;;  %v2220_v55 = vmul.f32 %v2189_v8, %v2170_v52  ;;  %v1946_v23 = vsel %vm578_vm4, %v4896_v1, %v1933_v31  ;;  %v1705_v8 = vrot.slane %v4901_v12, %v4266_v40  ;;  %v1798_v52 = vsel %vm428_vm6, %v1783_v17, %v4939_v62 }
 0x259   :  { %v3838_v43 = vpack.c.bf16 %v2333_v35, %v2333_v35  ;;  %v4969_v4 = vpop.permute.xlu0 %2046  ;;  %v2077_v35 = vrot.slane %v4848_v54, %v4266_v40  ;;  %v1825_v1 = vrot.slane %v4903_v28, %v4440_v48 }
 0x25a   :  { %v2057_v61 = vsel %vm692_vm2, %v4880_v56, %v4969_v4 }
 0x25b   :  { %3669 = vmatprep.subr.msk.bf16.mxu1 %vm1245_vm1, %v3838_v43  ;;  %v5000_v43 = vor.u32 %v1467_v53, %v1466_v50  ;;  %v2109_v56 = vmul.f32 %v2081_v41, %v2057_v61  ;;  %v2108_v53 = vmul.f32 %v2077_v35, %v2058_v19  ;;  %v1686_v41 = vsel %vm314_vm5, %v4937_v33, %v4935_v34 }
 0x25c   :  { %2672 = vmatpush1.bf16.msra.mxu1 %v2607_v27  ;;  %v4994_v11 = vpop.permute.xlu1 %2162  ;;  %v1965_v27 = vrot.slane %v4868_v44, %v4266_v40  ;;  %v1849_v61 = vmul.f32 %v1821_v60, %v1798_v52  ;;  %v1597_v19 = vrot.slane %v5002_v0, %v4285_v47  ;;  %v1574_v60 = vsel %vm200_vm8, %v4947_v39, %v4945_v30 }
 0x25d   :  { %5457 = vst [vmem:[#allocation20_spill] sm:$0xff] %v4994_v11  ;;  %v5004_v20 = vpop.permute.xlu0 %2158  ;;  %v3829_v31 = vpack.c.bf16 %v2220_v55, %v2108_v53  ;;  %v3822_v55 = vpack.c.bf16 %v1997_v6, %v4696_v25  ;;  %v1593_v53 = vrot.slane %v5002_v0, %v4266_v40  ;;  %v1687_v25 = vsel %vm314_vm5, %v4905_v24, %v4937_v33 }
 0x25e   :  { %v2169_v26 = vsel %vm806_vm3, %v4894_v36, %v5004_v20  ;;  %v1817_v36 = vrot.slane %v4903_v28, %v4266_v40  ;;  %v1996_v35 = vmul.f32 %v1965_v27, %v1946_v23  ;;  %v1462_v6 = vsel %vm87_vm7, %v4943_v63, %v4941_v59 }
 0x25f   :  { %v2221_v50 = vmul.f32 %v2193_v9, %v2169_v26  ;;  %v1799_v9 = vsel %vm428_vm6, %v4919_v32, %v1783_v17  ;;  %v1575_v33 = vsel %vm200_vm8, %v4931_v2, %v4947_v39  ;;  %v1589_v39 = vrot.slane %v5002_v0, %v4221_v14 }
 0x260   :  { %v5024_v11 = vpop.permute.xlu1 %1674  ;;  %v1848_v17 = vmul.f32 %v1817_v36, %v1799_v9  ;;  %v3821_v52 = vpack.c.bf16 %v1996_v35, %v4691_v5  ;;  %v1809_v9 = vrot.slane %v4903_v28, %v4226_v16 }
 0x261   :  { %v5030_v57 = vpop.permute.xlu0 %1938  ;;  %v3830_v26 = vpack.c.bf16 %v2221_v50, %v2109_v56  ;;  %v1685_v56 = vsel %vm314_vm5, %v4935_v34, %v5024_v11  ;;  %v1485_v50 = vrot.slane %v5000_v43, %v4285_v47  ;;  %v1489_v34 = vrot.slane %v5000_v43, %v4440_v48 }
 0x262   :  { %v1737_v47 = vmul.f32 %v1709_v18, %v1686_v41  ;;  %v1601_v18 = vrot.slane %v5002_v0, %v4440_v48  ;;  %v1481_v41 = vrot.slane %v5000_v43, %v4266_v40 }
 0x263   :  { %2673 = vmatprep.subr.bf16.mxu1 %v3830_v26  ;;  %v5075_v26 = vmul.f32 %v1713_v3, %v1685_v56  ;;  %v1513_v40 = vmul.f32 %v1485_v50, %v1462_v6  ;;  %v1697_v56 = vrot.slane %v4901_v12, %v4226_v16 }
 0x264   :  { %2674 = vmatpush1.bf16.msra.mxu1 %v3829_v31  ;;  %v5056_v32 = vpop.permute.xlu1 %1786  ;;  %v3814_v36 = vpack.c.bf16 %v1849_v61, %v1737_v47  ;;  %v1736_v31 = vmul.f32 %v1705_v8, %v1687_v25  ;;  %v1463_v8 = vsel %vm87_vm7, %v4927_v21, %v4943_v63  ;;  %v1576_v63 = vsel %vm200_vm8, %v4933_v15, %v4931_v2 }
 0x265   :  { %v1797_v27 = vsel %vm428_vm6, %v4939_v62, %v5056_v32  ;;  %v5068_v23 = vpop.permute.xlu0 %1450  ;;  %2675 = vmatprep.subr.bf16.mxu1 %v3822_v55  ;;  %v1625_v62 = vmul.f32 %v1597_v19, %v1574_v60  ;;  %v1512_v25 = vmul.f32 %v1481_v41, %v1463_v8  ;;  %v1464_v2 = vsel %vm87_vm7, %v4929_v51, %v4927_v21 }
 0x266   :  { %v5077_v24 = vmul.f32 %v1825_v1, %v1797_v27  ;;  %v1461_v3 = vsel %vm87_vm7, %v4941_v59, %v5068_v23  ;;  %v3813_v61 = vpack.c.bf16 %v1848_v17, %v1736_v31  ;;  %v1624_v59 = vmul.f32 %v1593_v53, %v1575_v33 }
 0x267   :  { %v5115_v55 = vmul.f32 %v1489_v34, %v1461_v3  ;;  %v3806_v60 = vpack.c.bf16 %v1625_v62, %v1513_v40  ;;  %v1477_v53 = vrot.slane %v5000_v43, %v4221_v14  ;;  %v1623_v14 = vmul.f32 %v1589_v39, %v1576_v63 }
 0x268   :  { %v3815_v5 = vpack.c.bf16 %v5077_v24, %v5075_v26  ;;  %2676 = vmatpush1.bf16.msra.mxu1 %v3821_v52  ;;  %v5093_v1 = vpop.permute.xlu1 %1792  ;;  %v3805_v27 = vpack.c.bf16 %v1624_v59, %v1512_v25  ;;  %v1585_v52 = vrot.slane %v5002_v0, %v4226_v16  ;;  %v1473_v21 = vrot.slane %v5000_v43, %v4226_v16 }
 0x269   :  { %v5103_v35 = vpop.permute.xlu0 %1562  ;;  %2677 = vmatprep.subr.bf16.mxu1 %v3814_v36  ;;  %v1511_v62 = vmul.f32 %v1477_v53, %v1464_v2  ;;  %v2309_v39 = vrot.slane %v4822_v22, %v4440_v48  ;;  %v2313_v40 = vrot.slane %v4822_v22, %v4443_v49 }
 0x26a   :  { %v1573_v19 = vsel %vm200_vm8, %v4945_v30, %v5103_v35  ;;  %v1801_v30 = vsel %vm428_vm6, %v5093_v1, %v4921_v45 }
 0x26b   :  { %v5117_v50 = vmul.f32 %v1601_v18, %v1573_v19  ;;  %v1846_v6 = vmul.f32 %v1809_v9, %v1801_v30  ;;  %v3804_v3 = vpack.c.bf16 %v1623_v14, %v1511_v62  ;;  %v1977_v14 = vrot.slane %v4868_v44, %v4443_v49 }
 0x26c   :  { %2678 = vmatpush1.bf16.msra.mxu1 %v3813_v61  ;;  %v5125_v47 = vpop.permute.xlu1 %1568  ;;  %v5458_v61 = vmov 0  }
 0x26d   :  { %v3807_v34 = vpack.c.bf16 %v5117_v50, %v5115_v55  ;;  %v5133_v17 = vpop.permute.xlu0 %1680  ;;  %2679 = vmatprep.subr.bf16.mxu1 %v3806_v60  ;;  %v1577_v18 = vsel %vm200_vm8, %v5125_v47, %v4933_v15 }
 0x26e   :  { %v1689_v45 = vsel %vm314_vm5, %v5133_v17, %v4907_v58  ;;  %v5150_v58 = vld [vmem:[%s5431_s4] sm:$0xf]  ;;  %v1622_v15 = vmul.f32 %v1585_v52, %v1577_v18  ;;  %v2197_v52 = vrot.slane %v4844_v29, %v4440_v48  ;;  %v1973_v18 = vrot.slane %v4868_v44, %v4440_v48 }
 0x26f   :  { %v1734_v33 = vmul.f32 %v1697_v56, %v1689_v45  ;;  %v2089_v45 = vrot.slane %v4848_v54, %v4443_v49 }
 0x270   :  { %2680 = vmatpush1.bf16.msra.mxu1 %v3805_v27  ;;  %v1937_v36 = vpop.permute.xlu1 %1936  ;;  %v2085_v27 = vrot.slane %v4848_v54, %v4440_v48 }
 0x271   :  { %v3811_v31 = vpack.c.bf16 %v1846_v6, %v1734_v33  ;;  %v5152_v41 = vpop.permute.xlu0 %1456  ;;  %v2201_v33 = vrot.slane %v4844_v29, %v4443_v49 }
 0x272   :  { %v1465_v16 = vsel %vm87_vm7, %v5152_v41, %v4929_v51 }
 0x273   :  { %v1510_v8 = vmul.f32 %v1473_v21, %v1465_v16  ;;  %2637 = vmatpush1.bf16.msra.mxu0 %v3811_v31  ;;  %3670 = vmatmul.mubr.msk.bf16.vlgmr.msra.gmra.mxu1 %vm1241_vm9, %v5150_v58 }
 0x274   :  { %2638 = vmatprep.subr.bf16.mxu0 %v3804_v3  ;;  %v2053_v9 = vpop.permute.xlu1 %2052  ;;  %2779 = vmatprep.mubr.bf16.mxu1 %v5458_v61  ;;  %v2317_v3 = vrot.slane %v4822_v22, %v4516_v37 }
 0x275   :  { %v3803_v59 = vpack.c.bf16 %v1622_v15, %v1510_v8  ;;  %v2273_v19 = vpop.permute.xlu0 %2272  ;;  %v1944_v15 = vsel %vm578_vm4, %v4955_v46, %v1937_v36  ;;  %v1985_v46 = vrot.slane %v4868_v44, %v4525_v42 }
 0x276   :  { %v2279_v51 = vsel %vm920_vm0, %v2273_v19, %v4959_v7  ;;  %v2280_v56 = vsel %vm920_vm0, %v4961_v10, %v2273_v19  ;;  %v1943_v10 = vsel %vm578_vm4, %v1937_v36, %v5030_v57  ;;  %v1998_v36 = vmul.f32 %v1973_v18, %v1944_v15 }
 0x277   :  { %v2334_v63 = vmul.f32 %v2309_v39, %v2280_v56  ;;  %v2335_v60 = vmul.f32 %v2313_v40, %v2279_v51  ;;  %2639 = vmatpush1.bf16.msra.mxu0 %v3803_v59  ;;  %v2321_v39 = vrot.slane %v4822_v22, %v4525_v42  ;;  %v1999_v8 = vmul.f32 %v1977_v14, %v1943_v10  ;;  %v5459_v40 = vld [vmem:[#allocation20_spill] sm:$0xff] }
 0x278   :  { %v5171_v53 = vpop.permute.xlu1 %1790  ;;  %v2093_v22 = vrot.slane %v4848_v54, %v4516_v37  ;;  %v2097_v56 = vrot.slane %v4848_v54, %v4525_v42  ;;  %v5460_v14 = vld [vmem:[#allocation16_spill] sm:$0xff] }
 0x279   :  { %v3839_v25 = vpack.c.bf16 %v2334_v63, %v2334_v63  ;;  %v3840_v30 = vpack.c.bf16 %v2335_v60, %v2335_v60  ;;  %v2049_v2 = vpop.permute.xlu0 %2048 }
 0x27a   :  { %3668 = vmatmul.mubr.msk.bf16.vlgmr.msra.gmra.mxu0 %vm1241_vm9, %v5150_v58  ;;  %v2055_v21 = vsel %vm692_vm2, %v2049_v2, %v4967_v38  ;;  %v2056_v62 = vsel %vm692_vm2, %v4969_v4, %v2049_v2 }
 0x27b   :  { %3671 = vmatprep.subr.msk.bf16.mxu0 %vm1245_vm1, %v3840_v30  ;;  %v2613_v6 = vsel %vm1245_vm1, %v3839_v25, 0  ;;  %2738 = vmatprep.mubr.bf16.mxu0 %v5458_v61  ;;  %v2110_v61 = vmul.f32 %v2085_v27, %v2056_v62  ;;  %v2111_v59 = vmul.f32 %v2089_v45, %v2055_v21  ;;  %v2054_v30 = vsel %vm692_vm2, %v4967_v38, %v2053_v9  ;;  %v5461_v45 = vld [vmem:[#allocation17_spill] sm:$0xff]  ;;  %v5462_v38 = vld [vmem:[#allocation15_spill] sm:$0xff]  ;;  %v5463_v62 = vld [vmem:[#allocation18_spill] sm:$0xff] }
 0x27c   :  { %2713 = vmatpush1.bf16.msra.mxu0 %v2613_v6  ;;  %v1941_v31 = vpop.permute.xlu1 %1940  ;;  %v2209_v27 = vrot.slane %v4844_v29, %v4525_v42  ;;  %v2061_v10 = vsel %vm692_vm2, %v2053_v9, %v5461_v45  ;;  %v3824_v21 = vpack.c.bf16 %v1999_v8, %v5462_v38  ;;  %v2112_v15 = vmul.f32 %v2093_v22, %v2054_v30  ;;  %v5465_v8 = vld [vmem:[#allocation19_spill] sm:$0xff] }
 0x27d   :  { %v2161_v16 = vpop.permute.xlu0 %2160  ;;  %v1949_v18 = vsel %vm578_vm4, %v1941_v31, %v5463_v62  ;;  %v1609_v62 = vrot.slane %v5002_v0, %v4516_v37 }
 0x27e   :  { %v2167_v4 = vsel %vm806_vm3, %v2161_v16, %v5459_v40  ;;  %v2168_v48 = vsel %vm806_vm3, %v5004_v20, %v2161_v16  ;;  %v2205_v20 = vrot.slane %v4844_v29, %v4516_v37  ;;  %v5464_v29 = vld [vmem:[#allocation12_spill] sm:$0xff] }
 0x27f   :  { %v2222_v19 = vmul.f32 %v2197_v52, %v2168_v48  ;;  %v2223_v51 = vmul.f32 %v2201_v33, %v2167_v4  ;;  %v3823_v16 = vpack.c.bf16 %v1998_v36, %v5464_v29 }
 0x280   :  { %v5234_v6 = vpop.permute.xlu1 %1452 }
 0x281   :  { %v3831_v63 = vpack.c.bf16 %v2222_v19, %v2110_v61  ;;  %v2277_v60 = vpop.permute.xlu0 %2276  ;;  %v3832_v25 = vpack.c.bf16 %v2223_v51, %v2111_v59  ;;  %v2001_v59 = vmul.f32 %v1985_v46, %v1949_v18  ;;  %v1829_v46 = vrot.slane %v4903_v28, %v4443_v49 }
 0x282   :  { %v2278_v2 = vsel %vm920_vm0, %v4959_v7, %v2277_v60  ;;  %v2285_v54 = vsel %vm920_vm0, %v2277_v60, %v5460_v14  ;;  %v1981_v7 = vrot.slane %v4868_v44, %v4516_v37  ;;  %v1717_v60 = vrot.slane %v4901_v12, %v4443_v49 }
 0x283   :  { %v2336_v52 = vmul.f32 %v2317_v3, %v2278_v2  ;;  %v2337_v33 = vmul.f32 %v2321_v39, %v2285_v54  ;;  %2714 = vmatprep.subr.bf16.mxu0 %v3832_v25  ;;  %v2113_v3 = vmul.f32 %v2097_v56, %v2061_v10  ;;  %v1942_v39 = vsel %vm578_vm4, %v5030_v57, %v1941_v31  ;;  %v5466_v25 = vld [vmem:[#allocation14_spill] sm:$0xff] }
 0x284   :  { %2715 = vmatpush1.bf16.msra.mxu0 %v3831_v63  ;;  %v1565_v56 = vpop.permute.xlu1 %1564  ;;  %v2000_v63 = vmul.f32 %v1981_v7, %v1942_v39  ;;  %v1837_v14 = vrot.slane %v4903_v28, %v4525_v42  ;;  %v1493_v54 = vrot.slane %v5000_v43, %v4443_v49  ;;  %v1721_v10 = vrot.slane %v4901_v12, %v4516_v37 }
 0x285   :  { %v3841_v4 = vpack.c.bf16 %v2336_v52, %v2336_v52  ;;  %v3842_v9 = vpack.c.bf16 %v2337_v33, %v2337_v33  ;;  %v2165_v48 = vpop.permute.xlu0 %2164  ;;  %2716 = vmatprep.subr.bf16.mxu0 %v3824_v21  ;;  %v1572_v30 = vsel %vm200_vm8, %v5103_v35, %v1565_v56  ;;  %v5467_v35 = vld [vmem:[#allocation13_spill] sm:$0xff] }
 0x286   :  { %v2166_v44 = vsel %vm806_vm3, %v5459_v40, %v2165_v48  ;;  %v2173_v61 = vsel %vm806_vm3, %v2165_v48, %v5465_v8  ;;  %v1605_v40 = vrot.slane %v5002_v0, %v4443_v49  ;;  %v3825_v52 = vpack.c.bf16 %v2000_v63, %v5467_v35 }
 0x287   :  { %v2224_v19 = vmul.f32 %v2205_v20, %v2166_v44  ;;  %v2225_v51 = vmul.f32 %v2209_v27, %v2173_v61  ;;  %3673 = vmatprep.subr.msk.bf16.mxu1 %vm1245_vm1, %v3842_v9  ;;  %v2619_v22 = vsel %vm1245_vm1, %v3841_v4, 0  ;;  %v3826_v20 = vpack.c.bf16 %v2001_v59, %v5466_v25 }
 0x288   :  { %2717 = vmatpush1.bf16.msra.mxu0 %v3823_v16  ;;  %2754 = vmatpush1.bf16.msra.mxu1 %v2619_v22  ;;  %v1833_v27 = vrot.slane %v4903_v28, %v4516_v37  ;;  %v1725_v49 = vrot.slane %v4901_v12, %v4525_v42  ;;  %v1794_v28 = vsel %vm428_vm6, %v5171_v53, %v5093_v1  ;;  %v1567_v18 = vpop.permute.xlu1 %1566 }
 0x289   :  { %v3833_v36 = vpack.c.bf16 %v2224_v19, %v2112_v15  ;;  %v1677_v57 = vpop.permute.xlu0 %1676  ;;  %v3834_v31 = vpack.c.bf16 %v2225_v51, %v2113_v3  ;;  %v1627_v38 = vmul.f32 %v1605_v40, %v1572_v30  ;;  %v1613_v12 = vrot.slane %v5002_v0, %v4525_v42 }
 0x28a   :  { %v1684_v2 = vsel %vm314_vm5, %v5024_v11, %v1677_v57  ;;  %v1460_v11 = vsel %vm87_vm7, %v5068_v23, %v5234_v6  ;;  %v1497_v1 = vrot.slane %v5000_v43, %v4516_v37  ;;  %v1853_v15 = vmul.f32 %v1837_v14, %v1794_v28 }
 0x28b   :  { %2755 = vmatprep.subr.bf16.mxu1 %v3834_v31  ;;  %v1739_v21 = vmul.f32 %v1717_v60, %v1684_v2  ;;  %v1570_v37 = vsel %vm200_vm8, %v1567_v18, %v5125_v47  ;;  %v1571_v44 = vsel %vm200_vm8, %v1565_v56, %v1567_v18  ;;  %v4016_v60 = vmov 0.0  }
 0x28c   :  { %2756 = vmatpush1.bf16.msra.mxu1 %v3833_v36  ;;  %v1628_v47 = vmul.f32 %v1609_v62, %v1571_v44  ;;  %v1629_v59 = vmul.f32 %v1613_v12, %v1570_v37  ;;  %v2970_v62 = vld [vmem:[%s5433_s6] sm:$0x3] }
 0x28d   :  { %v1789_v45 = vpop.permute.xlu0 %1788  ;;  %2757 = vmatprep.subr.bf16.mxu1 %v3826_v20  ;;  %v3145_v12 = vld [vmem:[%s5433_s6] sm:$0x3] }
 0x28e   :  { %v1796_v33 = vsel %vm428_vm6, %v5056_v32, %v1789_v45  ;;  %v1795_v23 = vsel %vm428_vm6, %v1789_v45, %v5171_v53  ;;  %v1515_v32 = vmul.f32 %v1493_v54, %v1460_v11  ;;  %v1501_v53 = vrot.slane %v5000_v43, %v4525_v42 }
 0x28f   :  { %v1851_v7 = vmul.f32 %v1829_v46, %v1796_v33  ;;  %v1852_v48 = vmul.f32 %v1833_v27, %v1795_v23 }
 0x290   :  { %2758 = vmatpush1.bf16.msra.mxu1 %v3825_v52  ;;  %v3808_v39 = vpack.c.bf16 %v1627_v38, %v1515_v32 }
 0x291   :  { %v1679_v29 = vpop.permute.xlu0 %1678  ;;  %v3816_v16 = vpack.c.bf16 %v1851_v7, %v1739_v21  ;;  %v2792_v21 = vld [vmem:[%s5433_s6] sm:$0x3] }
 0x292   :  { %v1682_v4 = vsel %vm314_vm5, %v1679_v29, %v5133_v17  ;;  %v1683_v9 = vsel %vm314_vm5, %v1677_v57, %v1679_v29 }
 0x293   :  { %v1740_v3 = vmul.f32 %v1721_v10, %v1683_v9  ;;  %v1741_v0 = vmul.f32 %v1725_v49, %v1682_v4  ;;  %2718 = vmatprep.subr.bf16.mxu0 %v3816_v16  ;;  %v3320_v16 = vld [vmem:[%s5433_s6] sm:$0x3] }
 0x294   :  { %2719 = vmatpush1.bf16.msra.mxu0 %v3815_v5 }
 0x295   :  { %v3817_v17 = vpack.c.bf16 %v1852_v48, %v1740_v3  ;;  %v1455_v8 = vpop.permute.xlu0 %1454  ;;  %2720 = vmatprep.subr.bf16.mxu0 %v3808_v39  ;;  %v3818_v42 = vpack.c.bf16 %v1853_v15, %v1741_v0  ;;  %v2869_v3 = vld [vmem:[%s5435_s8] sm:$0xff] }
 0x296   :  { %v1458_v43 = vsel %vm87_vm7, %v1455_v8, %v5152_v41  ;;  %v1459_v61 = vsel %vm87_vm7, %v5234_v6, %v1455_v8 }
 0x297   :  { %v1516_v19 = vmul.f32 %v1497_v1, %v1459_v61  ;;  %v1517_v51 = vmul.f32 %v1501_v53, %v1458_v43  ;;  %2759 = vmatprep.subr.bf16.mxu1 %v3818_v42  ;;  %v2793_v1 = vld [vmem:[%s5434_s7] sm:$0x3] }
 0x298   :  { %2721 = vmatpush1.bf16.msra.mxu0 %v3807_v34  ;;  %2760 = vmatpush1.bf16.msra.mxu1 %v3817_v17  ;;  %v2971_v53 = vld [vmem:[%s5434_s7] sm:$0x3] }
 0x299   :  { %v3809_v26 = vpack.c.bf16 %v1628_v47, %v1516_v19  ;;  %v3810_v24 = vpack.c.bf16 %v1629_v59, %v1517_v51  ;;  %3859 = vmatprep.subr.mxu0 %v4016_v60  ;;  %v3146_v17 = vld [vmem:[%s5434_s7] sm:$0x3] }
 0x29a   :  { %v3321_v61 = vld [vmem:[%s5434_s7] sm:$0x3] }
 0x29b   :  { %3672 = vmatmul.mubr.msk.bf16.vlgmr.msra.gmra.mxu0 %vm1241_vm9, %v5150_v58  ;;  %2761 = vmatprep.subr.bf16.mxu1 %v3810_v24  ;;  %v2870_v24 = vld [vmem:[%s5436_s9] sm:$0xff]  ;;  %s4018_s9 = smov [#allocation8]  }
 0x29c   :  { %2762 = vmatpush1.bf16.msra.mxu1 %v3809_v26  ;;  %3861 = vmatprep.mubr.msk.f32.mxu0 %vm4017_vm10, %v4016_v60  ;;  %s3497_s28 = sshll.u32 %s4018_s9, 4  ;;  %s3498_s28 = int_to_ptr.vmem [resolvable:$true] %s3497_s28 }
 0x29d   :  { %3864 = vmatprep.subr.mxu1 %v4016_v60  ;;  %s3979_s29 = scalar_lea.vmem %s3498_s28, 1024  ;;  %p3984_p11 = scmp.lt.s32.totalorder %s3498_s28, %s3498_s28 }
 0x29e   :  { %p3980_p10 = scmp.ne.s32.totalorder %s3498_s28, %s3979_s29  ;;  %p3985_p12 = scmp.lt.s32.totalorder %s3979_s29, %s3979_s29 }
 0x29f   :  { %3674 = vmatmul.mubr.msk.bf16.vlgmr.msra.gmra.mxu1 %vm1241_vm9, %v5150_v58 }
 0x2a0   :  { %3866 = vmatprep.mubr.msk.f32.mxu1 %vm4017_vm10, %v4016_v60  ;;  %p3986_p13 = por %p3985_p12, %p3984_p11 }
 0x2a2   :  { %v2415_v5 = vpop.permute.xlu0 %2414  ;;  %p3987_p0 = pnand %p3986_p13, %p3980_p10 }
 0x333   :  { %v2699_v13 = vpop.f32.mrf.mxu1 }
 0x334   :  { %v5326_v6 = vadd.f32 %v2699_v13, %v2415_v5 }
 0x335   :  { %v2701_v41 = vpop.f32.mrf.mxu1 }
 0x336   :  { %v5328_v22 = vadd.f32 %v2701_v41, %v2415_v5 }
 0x337   :  { %v2703_v55 = vpop.f32.mrf.mxu1 }
 0x338   :  { %v2966_v50 = vadd.f32 %v5328_v22, %v5326_v6 }
 0x339   :  { %v2704_v34 = vpop.f32.mrf.mxu1 }
 0x33a   :  { %2967 = vadd.xlane.f32.xlu0 %v2966_v50  ;;  %v2658_v56 = vpop.f32.mrf.mxu0 }
 0x33b   :  { %v5332_v57 = vadd.f32 %v2658_v56, %v2415_v5 }
 0x33c   :  { %v2660_v36 = vpop.f32.mrf.mxu0 }
 0x33d   :  { %v5334_v31 = vadd.f32 %v2660_v36, %v2415_v5 }
 0x33e   :  { %v2662_v58 = vpop.f32.mrf.mxu0 }
 0x33f   :  { %v2788_v63 = vadd.f32 %v5334_v31, %v5332_v57 }
 0x340   :  { %v2663_v40 = vpop.f32.mrf.mxu0 }
 0x341   :  { %2789 = vadd.xlane.f32.xlu1 %v2788_v63 }
 0x35b   :  { %v2740_v46 = vpop.f32.mrf.mxu0 }
 0x35c   :  { %v5344_v20 = vadd.f32 %v2740_v46, %v2415_v5 }
 0x35d   :  { %v2742_v25 = vpop.f32.mrf.mxu0 }
 0x35e   :  { %v5346_v30 = vadd.f32 %v2742_v25, %v2415_v5 }
 0x35f   :  { %v2744_v2 = vpop.f32.mrf.mxu0  ;;  %v2781_v14 = vpop.f32.mrf.mxu1 }
 0x360   :  { %v3141_v54 = vadd.f32 %v5346_v30, %v5344_v20  ;;  %v5350_v10 = vadd.f32 %v2781_v14, %v2415_v5 }
 0x361   :  { %v2745_v27 = vpop.f32.mrf.mxu0  ;;  %v2783_v45 = vpop.f32.mrf.mxu1 }
 0x362   :  { %v5352_v35 = vadd.f32 %v2783_v45, %v2415_v5  ;;  %3142 = vadd.xlane.f32.xlu0 %v3141_v54 }
 0x363   :  { %v2785_v52 = vpop.f32.mrf.mxu1 }
 0x364   :  { %v3316_v11 = vadd.f32 %v5352_v35, %v5350_v10 }
 0x365   :  { %v2786_v33 = vpop.f32.mrf.mxu1 }
 0x366   :  { %3317 = vadd.xlane.f32.xlu1 %v3316_v11 }
 0x3c3   :  { %v2968_v49 = vpop.xlane.xlu0 %2967 }
 0x3c4   :  { %v2969_v7 = vmul.f32 0.00390625, %v2968_v49 }
 0x3ca   :  { %v2790_v28 = vpop.xlane.xlu1 %2789 }
 0x3cb   :  { %v2791_v38 = vmul.f32 0.00390625, %v2790_v28 }
 0x3cd   :  { %3860 = vmatpush3.msra.mxu0 %v2791_v38 }
 0x3ce   :  { %3862 = vmatmul.mubr.msk.f32.vlgmr.msra.gmra.mxu0 %vm2794_vm11, %v2792_v21  ;;  %3869 = vmatprep.subr.mxu0 %v4016_v60 }
 0x3cf   :  { %3870 = vmatpush3.msra.mxu0 %v2969_v7  ;;  %3871 = vmatprep.mubr.msk.f32.mxu0 %vm4017_vm10, %v4016_v60 }
 0x3d0   :  { %3879 = vmatprep.subr.mxu0 %v4016_v60 }
 0x3d2   :  { %3872 = vmatmul.mubr.msk.f32.vlgmr.msra.gmra.mxu0 %vm2794_vm11, %v2970_v62 }
 0x3d3   :  { %3881 = vmatprep.mubr.msk.f32.mxu0 %vm4017_vm10, %v4016_v60 }
 0x3eb   :  { %v3143_v23 = vpop.xlane.xlu0 %3142 }
 0x3ec   :  { %v3144_v32 = vmul.f32 0.00390625, %v3143_v23 }
 0x3ee   :  { %3880 = vmatpush3.msra.mxu0 %v3144_v32 }
 0x3ef   :  { %3882 = vmatmul.mubr.msk.f32.vlgmr.msra.gmra.mxu0 %vm2794_vm11, %v3145_v12  ;;  %v3318_v18 = vpop.xlane.xlu1 %3317  ;;  %3889 = vmatprep.subr.mxu0 %v4016_v60 }
 0x3f0   :  { %v3319_v29 = vmul.f32 0.00390625, %v3318_v18  ;;  %3891 = vmatprep.mubr.msk.f32.mxu0 %vm4017_vm10, %v4016_v60  ;;  %v3931_v18 = vld [vmem:[#allocation3] sm:$0xff] }
 0x3f2   :  { %3890 = vmatpush3.msra.mxu0 %v3319_v29 }
 0x3f3   :  { %3892 = vmatmul.mubr.msk.f32.vlgmr.msra.gmra.mxu0 %vm2794_vm11, %v3320_v16  ;;  %v3932_v16 = vld [vmem:[#allocation3 + $0x8] sm:$0xff] }
 0x48e   :  { %v2864_v15 = vpop.f32.mrf.mxu0 }
 0x48f   :  { %v2865_v4 = vadd.f32 %v2864_v15, %v2793_v1 }
 0x490   :  { %v3863_v9 = vpop.f32.mrf.mxu0 }
 0x491   :  { %v2868_v48 = vmax.f32 %v2865_v4, 0.0 }
 0x492   :  { %v3041_v0 = vpop.f32.mrf.mxu0 }
 0x493   :  { %v3042_v39 = vadd.f32 %v3041_v0, %v2971_v53  ;;  %3865 = vmatpush3.msk.msra.mxu1 %vm2875_vm12, %v2868_v48  ;;  %v3933_v53 = vld [vmem:[#allocation3 + $0x10] sm:$0xff] }
 0x494   :  { %3867 = vmatmul.mubr.msk.f32.vlgmr.msra.gmra.mxu1 %vm2871_vm13, %v2869_v3  ;;  %3874 = vmatprep.subr.mxu1 %v4016_v60  ;;  %v3873_v37 = vpop.f32.mrf.mxu0 }
 0x495   :  { %v3045_v44 = vmax.f32 %v3042_v39, 0.0  ;;  %3876 = vmatprep.mubr.msk.f32.mxu1 %vm4017_vm10, %v4016_v60  ;;  %v3935_v37 = vld [vmem:[#allocation3 + $0x20] sm:$0xff] }
 0x497   :  { %3875 = vmatpush3.msk.msra.mxu1 %vm2875_vm12, %v3045_v44 }
 0x498   :  { %3877 = vmatmul.mubr.msk.f32.vlgmr.msra.gmra.mxu1 %vm2871_vm13, %v2869_v3  ;;  %3884 = vmatprep.subr.mxu1 %v4016_v60 }
 0x499   :  { %3886 = vmatprep.mubr.msk.f32.mxu1 %vm4017_vm10, %v4016_v60 }
 0x4af   :  { %v3216_v8 = vpop.f32.mrf.mxu0 }
 0x4b0   :  { %v3217_v42 = vadd.f32 %v3216_v8, %v3146_v17  ;;  %v3936_v17 = vld [vmem:[#allocation3 + $0x28] sm:$0xff] }
 0x4b1   :  { %v3883_v43 = vpop.f32.mrf.mxu0 }
 0x4b2   :  { %v3220_v47 = vmax.f32 %v3217_v42, 0.0  ;;  %v3937_v43 = vld [vmem:[#allocation3 + $0x30] sm:$0xff] }
 0x4b3   :  { %v3391_v59 = vpop.f32.mrf.mxu0 }
 0x4b4   :  { %v3392_v19 = vadd.f32 %v3391_v59, %v3321_v61  ;;  %3885 = vmatpush3.msk.msra.mxu1 %vm2875_vm12, %v3220_v47  ;;  %v3938_v47 = vld [vmem:[#allocation3 + $0x38] sm:$0xff] }
 0x4b5   :  { %3887 = vmatmul.mubr.msk.f32.vlgmr.msra.gmra.mxu1 %vm2871_vm13, %v2869_v3  ;;  %v3893_v51 = vpop.f32.mrf.mxu0  ;;  %3894 = vmatprep.subr.mxu1 %v4016_v60 }
 0x4b6   :  { %v3395_v26 = vmax.f32 %v3392_v19, 0.0  ;;  %3896 = vmatprep.mubr.msk.f32.mxu1 %vm4017_vm10, %v4016_v60 }
 0x4b8   :  { %3895 = vmatpush3.msk.msra.mxu1 %vm2875_vm12, %v3395_v26 }
 0x4b9   :  { %3897 = vmatmul.mubr.msk.f32.vlgmr.msra.gmra.mxu1 %vm2871_vm13, %v2869_v3  ;;  %v3934_v3 = vld [vmem:[#allocation3 + $0x18] sm:$0xff] }
 0x554   :  { %v2945_v13 = vpop.f32.mrf.mxu1 }
 0x555   :  { %v2946_v5 = vadd.f32 %v2945_v13, %v2870_v24 }
 0x556   :  { %v3868_v41 = vpop.f32.mrf.mxu1 }
 0x557   :  { %v3678_v55 = vmul.f32 -1.442695, %v2946_v5 }
 0x558   :  { %v3120_v50 = vpop.f32.mrf.mxu1 }
 0x559   :  { %3915 = vpow2.f32 %v3678_v55  ;;  %v3121_v34 = vadd.f32 %v3120_v50, %v2870_v24 }
 0x55a   :  { %v3878_v56 = vpop.f32.mrf.mxu1 }
 0x55b   :  { %v3682_v36 = vmul.f32 -1.442695, %v3121_v34 }
 0x55d   :  { %3917 = vpow2.f32 %v3682_v36 }
 0x566   :  { %v3916_v58 = vpop.eup %3915 }
 0x567   :  { %v2952_v63 = vadd.f32 1.0, %v3916_v58 }
 0x569   :  { %3919 = vrcp.f32 %v2952_v63 }
 0x56a   :  { %v3918_v40 = vpop.eup %3917 }
 0x56b   :  { %v3127_v60 = vadd.f32 1.0, %v3918_v40 }
 0x56d   :  { %3921 = vrcp.f32 %v3127_v60 }
 0x575   :  { %v3295_v46 = vpop.f32.mrf.mxu1 }
 0x576   :  { %v3920_v25 = vpop.eup %3919  ;;  %v3296_v2 = vadd.f32 %v3295_v46, %v2870_v24 }
 0x577   :  { %2957 = vperm.xlu0 %3913, %v3920_v25   ;;  %v3888_v14 = vpop.f32.mrf.mxu1 }
 0x578   :  { %v3686_v54 = vmul.f32 -1.442695, %v3296_v2 }
 0x579   :  { %v3470_v27 = vpop.f32.mrf.mxu1 }
 0x57a   :  { %v3922_v45 = vpop.eup %3921  ;;  %3923 = vpow2.f32 %v3686_v54  ;;  %v3471_v52 = vadd.f32 %v3470_v27, %v2870_v24 }
 0x57b   :  { %3132 = vperm.xlu1 %3914, %v3922_v45   ;;  %v3898_v11 = vpop.f32.mrf.mxu1 }
 0x57c   :  { %v3690_v33 = vmul.f32 -1.442695, %v3471_v52 }
 0x57e   :  { %3925 = vpow2.f32 %v3690_v33 }
 0x587   :  { %v3924_v49 = vpop.eup %3923 }
 0x588   :  { %v3302_v28 = vadd.f32 1.0, %v3924_v49 }
 0x58a   :  { %3927 = vrcp.f32 %v3302_v28 }
 0x58b   :  { %v3926_v38 = vpop.eup %3925 }
 0x58c   :  { %v3477_v21 = vadd.f32 1.0, %v3926_v38 }
 0x58e   :  { %3929 = vrcp.f32 %v3477_v21 }
 0x597   :  { %v3928_v7 = vpop.eup %3927 }
 0x598   :  { %3307 = vperm.xlu1 %3914, %v3928_v7  }
 0x59b   :  { %v3930_v62 = vpop.eup %3929 }
 0x59c   :  { %3482 = vperm.xlu0 %3913, %v3930_v62  }
 0x5f2   :  { %v2958_v23 = vpop.permute.xlu0 %2957 }
 0x5f3   :  { %v2960_v32 = vmul.f32 %v2958_v23, %v5332_v57  ;;  %v2961_v12 = vmul.f32 %v2958_v23, %v5334_v31 }
 0x5f5   :  { %v2962_v29 = vadd.f32 %v3931_v18, %v2960_v32  ;;  %v2963_v1 = vadd.f32 %v3932_v16, %v2961_v12 }
 0x5f6   :  { %v3133_v15 = vpop.permute.xlu1 %3132 }
 0x5f7   :  { %2964 = vst [vmem:[#allocation8] sm:$0xff] %v2962_v29  ;;  %2965 = vst [vmem:[#allocation8 + $0x8] sm:$0xff] %v2963_v1  ;;  %v3135_v4 = vmul.f32 %v3133_v15, %v5326_v6  ;;  %v3136_v9 = vmul.f32 %v3133_v15, %v5328_v22 }
 0x5f9   :  { %v3137_v48 = vadd.f32 %v3933_v53, %v3135_v4  ;;  %v3138_v0 = vadd.f32 %v3934_v3, %v3136_v9 }
 0x5fb   :  { %3139 = vst [vmem:[#allocation8 + $0x10] sm:$0xff] %v3137_v48  ;;  %3140 = vst [vmem:[#allocation8 + $0x18] sm:$0xff] %v3138_v0 }
 0x613   :  { %v3308_v57 = vpop.permute.xlu1 %3307 }
 0x614   :  { %v3310_v31 = vmul.f32 %v3308_v57, %v5344_v20  ;;  %v3311_v39 = vmul.f32 %v3308_v57, %v5346_v30 }
 0x616   :  { %v3312_v44 = vadd.f32 %v3935_v37, %v3310_v31  ;;  %v3313_v8 = vadd.f32 %v3936_v17, %v3311_v39 }
 0x617   :  { %v3483_v42 = vpop.permute.xlu0 %3482 }
 0x618   :  { %3314 = vst [vmem:[#allocation8 + $0x20] sm:$0xff] %v3312_v44  ;;  %3315 = vst [vmem:[#allocation8 + $0x28] sm:$0xff] %v3313_v8  ;;  %v3485_v6 = vmul.f32 %v3483_v42, %v5350_v10  ;;  %v3486_v22 = vmul.f32 %v3483_v42, %v5352_v35 }
 0x61a   :  { %v3487_v61 = vadd.f32 %v3937_v43, %v3485_v6  ;;  %v3488_v59 = vadd.f32 %v3938_v47, %v3486_v22 }
 0x61c   :  { %3489 = vst [vmem:[#allocation8 + $0x30] sm:$0xff] %v3487_v61  ;;  %3490 = vst [vmem:[#allocation8 + $0x38] sm:$0xff] %v3488_v59 }
 0x61d   :  { %3990 = shalt.err (!%p3987_p0)
}
 0x61e   :  { %3500 = dma.vmem_to_hbm [thread:$0]  %s3498_s28, 1024, %s5437_s10, [#allocation5]  }
 0x61f   :  { %4003 = dma.done.wait [#allocation5], 1024  }
 0x620   :  { %4004 = vsyncadd [#allocation5], 4294966272 }
 0x621   :  { %3504 = vsyncpa [#allocation4], 1 }
 0x622   :  { %3505 = vsyncpa [#allocation7], 1 }
 0x623   :  { %3506 = vsyncpa [#allocation5], 1 }

</bundles_post_ra>
